<compile_context>
chip_gen: v7x
topology: tpu7x:2x2x1
jax: 0.10.0
libtpu: 0.0.40
codegen_flags: <defaults>
</compile_context>

<pallas_src>
import functools
import math

import jax
import jax.numpy as jnp
from jax import lax
from jax.experimental import pallas as pl
from jax.experimental.pallas import tpu as pltpu


# ---------------------------------------------------------------------------
# fused encoder kernel: init_embed + n_layers x (MHA+res, FFN+res) + graph mean
# ---------------------------------------------------------------------------
def _encoder_fused_kernel(*refs, n_layers, has_embed):
    if has_embed:
        (x_ref, w_init_ref, b_init_ref,
         wqkv_ref, wo_ref, bo_ref,
         w1_ref, b1_ref, w2_ref, b2_ref,
         h_ref, mean_ref) = refs
    else:
        (x_ref,
         wqkv_ref, wo_ref, bo_ref,
         w1_ref, b1_ref, w2_ref, b2_ref,
         h_ref, mean_ref) = refs

    tb, s, _ = x_ref.shape
    hdim = wo_ref.shape[-1]

    # ---- init embedding (tiny contraction dim -> VPU broadcast FMAs) ----
    if has_embed:
        x = x_ref[...].astype(jnp.float32)                 # (tb, s, nd)
        nd = x.shape[-1]
        w_init = w_init_ref[...]                           # (nd, hdim) f32
        h = jnp.zeros((tb, s, hdim), jnp.float32) + b_init_ref[...]
        for kk in range(nd):
            h = h + x[:, :, kk:kk + 1] * w_init[kk:kk + 1, :]
    else:
        h = x_ref[...].astype(jnp.float32)                 # (tb, s, hdim)

    # residual stream kept flat (tb*s, hdim) in f32, resident in VMEM/vregs
    h2 = h.reshape(tb * s, hdim)

    for l in range(n_layers):
        # ---------------- MHA + residual (single-head config) ----------------
        qkv = jnp.dot(h2.astype(jnp.bfloat16), wqkv_ref[l],
                      preferred_element_type=jnp.float32)  # (tb*s, 3H), norm folded in Wq
        q = qkv[:, :hdim].reshape(tb, s, hdim).astype(jnp.bfloat16)
        k = qkv[:, hdim:2 * hdim].reshape(tb, s, hdim).astype(jnp.bfloat16)
        v = qkv[:, 2 * hdim:].reshape(tb, s, hdim).astype(jnp.bfloat16)

        scores = jnp.einsum("bqd,bkd->bqk", q, k,
                            preferred_element_type=jnp.float32)      # (tb, s, s)
        scores = scores - jnp.max(scores, axis=-1, keepdims=True)
        p = jnp.exp(scores)
        inv = pl.reciprocal(jnp.sum(p, axis=-1, keepdims=True), approx=True)
        attn = (p * inv).astype(jnp.bfloat16)               # S < H -> normalize scores

        heads = jnp.einsum("bqk,bkd->bqd", attn, v,
                           preferred_element_type=jnp.float32)       # (tb, s, H)
        y = jnp.dot(heads.reshape(tb * s, hdim).astype(jnp.bfloat16), wo_ref[l],
                    preferred_element_type=jnp.float32) + bo_ref[l]
        h2 = h2 + y                                          # residual in f32

        # ---------------- FFN + residual ----------------
        mid = jnp.dot(h2.astype(jnp.bfloat16), w1_ref[l],
                      preferred_element_type=jnp.float32) + b1_ref[l]
        mid = jnp.maximum(mid, 0.0)
        y2 = jnp.dot(mid.astype(jnp.bfloat16), w2_ref[l],
                     preferred_element_type=jnp.float32) + b2_ref[l]
        h2 = h2 + y2

    hout = h2.reshape(tb, s, hdim)
    h_ref[...] = hout.astype(h_ref.dtype)
    # graph-mean readout fused into the epilogue (no extra HBM pass over h_final)
    mean_ref[...] = (jnp.sum(hout, axis=1, keepdims=True) * (1.0 / s)).astype(mean_ref.dtype)


def _pick_batch_tile(b, s, token_cap=512):
    """Largest divisor of b with tb*s <= token_cap; prefer >=2 grid steps (megacore)
    only when each step still gets a reasonable number of tokens."""
    cap = max(1, token_cap // max(s, 1))
    best = 1
    for cand in range(1, b + 1):
        if b % cand == 0 and cand <= cap:
            best = cand
    if best == b and b > 1:
        for cand in range(b // 2, 0, -1):
            if b % cand == 0 and cand * s >= 128:
                return cand
    return best


def encoder_fused_pallas(x, w_init, b_init, wqkv, wo, bo, w1, b1, w2, b2, *, n_layers):
    has_embed = w_init is not None
    b, s, in_dim = x.shape
    hdim = wo.shape[-1]
    tb = _pick_batch_tile(b, s)
    grid = (b // tb,)

    kernel = functools.partial(_encoder_fused_kernel,
                               n_layers=n_layers, has_embed=has_embed)

    def resident(shape):
        return pl.BlockSpec(shape, lambda i: (0,) * len(shape))

    in_specs = [pl.BlockSpec((tb, s, in_dim), lambda i: (i, 0, 0))]
    args = [x]
    if has_embed:
        in_specs += [resident(w_init.shape), resident(b_init.shape)]
        args += [w_init, b_init]
    in_specs += [resident(wqkv.shape), resident(wo.shape), resident(bo.shape),
                 resident(w1.shape), resident(b1.shape),
                 resident(w2.shape), resident(b2.shape)]
    args += [wqkv, wo, bo, w1, b1, w2, b2]

    out_shape = (jax.ShapeDtypeStruct((b, s, hdim), x.dtype),
                 jax.ShapeDtypeStruct((b, 1, hdim), x.dtype))
    out_specs = (pl.BlockSpec((tb, s, hdim), lambda i: (i, 0, 0)),
                 pl.BlockSpec((tb, 1, hdim), lambda i: (i, 0, 0)))

    h_out, mean_out = pl.pallas_call(
        kernel,
        out_shape=out_shape,
        grid=grid,
        in_specs=in_specs,
        out_specs=out_specs,
        compiler_params=pltpu.CompilerParams(
            dimension_semantics=("parallel",),
            vmem_limit_bytes=32 * 1024 * 1024),   # safe on v5e/v6e/v7x; tiles sized well below
    )(*args)
    return h_out, mean_out[:, 0, :]


# ---------------------------------------------------------------------------
# param packing: fold norm into Wq, concat QKV, stack layers, bf16 weights
# ---------------------------------------------------------------------------
def _pack_params(params):
    if params.get("init_embed") is not None:
        w_init, b_init = params["init_embed"]
        w_init = w_init.astype(jnp.float32)
        b_init = b_init.reshape(1, -1).astype(jnp.float32)
    else:
        w_init = b_init = None

    wqkv, wo, bo, w1, b1, w2, b2 = [], [], [], [], [], [], []
    for layer in params["layers"]:
        lwq, lwk, lwv, lwo, lbo = layer["mha"]
        norm = 1.0 / math.sqrt(lwq.shape[1])          # 1 / sqrt(key_dim)
        wqkv.append(jnp.concatenate([lwq * norm, lwk, lwv], axis=1))
        wo.append(lwo)
        bo.append(lbo.reshape(1, -1))
        lw1, lb1, lw2, lb2 = layer["ffn"]
        w1.append(lw1)
        b1.append(lb1.reshape(1, -1))
        w2.append(lw2)
        b2.append(lb2.reshape(1, -1))

    bf = lambda xs: jnp.stack(xs).astype(jnp.bfloat16)
    f32 = lambda xs: jnp.stack(xs).astype(jnp.float32)
    return (w_init, b_init, bf(wqkv), bf(wo), f32(bo), bf(w1), f32(b1), bf(w2), f32(b2))


def graph_attention_encoder_forward(x, params, *, graph_size, mask=None, evaluate=False):
    # TODO(synk): mask / evaluate branch of the reference is not implemented
    #             (default reference path uses mask=None, which is what runs here).
    assert mask is None, "masked attention path not implemented"
    packed = _pack_params(params)
    n_layers = len(params["layers"])
    h, g = encoder_fused_pallas(x, *packed, n_layers=n_layers)
    return h, g


# ---------------------------------------------------------------------------
# pure-JAX f32 reference (same math) for the correctness check
# ---------------------------------------------------------------------------
def _ref_forward(x, params):
    hp = lax.Precision.HIGHEST
    if params.get("init_embed") is not None:
        w, b = params["init_embed"]
        h = jnp.einsum("bsn,nh->bsh", x, w, precision=hp) + b
    else:
        h = x
    for layer in params["layers"]:
        wq, wk, wv, wo, bo = layer["mha"]
        norm = 1.0 / math.sqrt(wq.shape[1])
        q = jnp.einsum("bsh,hk->bsk", h, wq, precision=hp)
        k = jnp.einsum("bsh,hk->bsk", h, wk, precision=hp)
        v = jnp.einsum("bsh,hk->bsk", h, wv, precision=hp)
        compat = norm * jnp.einsum("bqk,bjk->bqj", q, k, precision=hp)
        attn = jax.nn.softmax(compat, axis=-1)
        heads = jnp.einsum("bqj,bjv->bqv", attn, v, precision=hp)
        h = h + (jnp.einsum("bqv,vh->bqh", heads, wo, precision=hp) + bo)
        w1, b1, w2, b2 = layer["ffn"]
        ff = jnp.maximum(jnp.einsum("bsh,hf->bsf", h, w1, precision=hp) + b1, 0.0)
        h = h + (jnp.einsum("bsf,fh->bsh", ff, w2, precision=hp) + b2)
    return h, h.mean(axis=1)


if __name__ == "__main__":
    # Small shapes consistent with the encoder: batch=2, graph_size(seq)=8,
    # node_dim=2 coordinates, embed_dim=128, feed_forward_hidden=128, 2 layers.
    B, S = 2, 8
    NODE_DIM = 2
    EMBED = 128            # lane-dense hidden (multiple of 128)
    FF = 128
    N_LAYERS = 2
    N_HEADS = 1            # only configuration for which the reference type-checks

    keys = iter(jax.random.split(jax.random.PRNGKey(0), 64))

    def u(shape, scale):   # PyTorch-style uniform(-stdv, stdv) init
        return jax.random.uniform(next(keys), shape, jnp.float32, -scale, scale)

    x = jax.random.normal(next(keys), (B, S, NODE_DIM), dtype=jnp.float32)

    params = {
        "init_embed": (u((NODE_DIM, EMBED), 1.0 / math.sqrt(NODE_DIM)),
                       u((EMBED,), 1.0 / math.sqrt(NODE_DIM))),
        "layers": [],
    }
    sd = 1.0 / math.sqrt(EMBED)
    sf = 1.0 / math.sqrt(FF)
    for _ in range(N_LAYERS):
        params["layers"].append({
            "mha": (u((EMBED, EMBED), sd), u((EMBED, EMBED), sd),
                    u((EMBED, EMBED), sd), u((EMBED, EMBED), sd), u((EMBED,), sd)),
            "ffn": (u((EMBED, FF), sd), u((FF,), sd),
                    u((FF, EMBED), sf), u((EMBED,), sf)),
        })

    h_out, g_out = graph_attention_encoder_forward(x, params, graph_size=S, mask=None)
    jax.block_until_ready(h_out)
    jax.block_until_ready(g_out)

    h_ref, g_ref = _ref_forward(x, params)
    assert h_out.shape == (B, S, EMBED) and g_out.shape == (B, EMBED)
    # bf16 MXU operands (weights + activations) vs. the f32 HIGHEST reference:
    # tolerance loosened accordingly (accumulation / softmax / residuals are f32).
    assert jnp.allclose(h_out, h_ref, atol=5e-2, rtol=5e-2), \
        float(jnp.max(jnp.abs(h_out - h_ref)))
    assert jnp.allclose(g_out, g_ref, atol=5e-2, rtol=5e-2), \
        float(jnp.max(jnp.abs(g_out - g_ref)))

    print("KERNEL_OK")
</pallas_src>

<mosaic_0001>
module attributes {stable_mosaic.version = 11 : i64} {
  func.func @_encoder_fused_kernel(%arg0: i32, %arg1: memref<2x8x2xf32, #tpu.memory_space<vmem>>, %arg2: memref<2x128xf32, #tpu.memory_space<vmem>>, %arg3: memref<1x128xf32, #tpu.memory_space<vmem>>, %arg4: memref<2x128x384xbf16, #tpu.memory_space<vmem>>, %arg5: memref<2x128x128xbf16, #tpu.memory_space<vmem>>, %arg6: memref<2x1x128xf32, #tpu.memory_space<vmem>>, %arg7: memref<2x128x128xbf16, #tpu.memory_space<vmem>>, %arg8: memref<2x1x128xf32, #tpu.memory_space<vmem>>, %arg9: memref<2x128x128xbf16, #tpu.memory_space<vmem>>, %arg10: memref<2x1x128xf32, #tpu.memory_space<vmem>>, %arg11: memref<2x8x128xf32, #tpu.memory_space<vmem>>, %arg12: memref<2x1x128xf32, #tpu.memory_space<vmem>>) attributes {dimension_semantics = [#tpu.dimension_semantics<parallel>], iteration_bounds = array<i64: 1>, scalar_prefetch = 0 : i64, scratch_operands = 0 : i64, tpu.core_type = #tpu.core_type<tc>, window_params = [{transform_indices = @transform_0, window_bounds = array<i64: 2, 8, 2>}, {pipeline_mode = #tpu.pipeline_mode<synchronous>, transform_indices = @transform_1, window_bounds = array<i64: 2, 128>}, {pipeline_mode = #tpu.pipeline_mode<synchronous>, transform_indices = @transform_2, window_bounds = array<i64: 1, 128>}, {pipeline_mode = #tpu.pipeline_mode<synchronous>, transform_indices = @transform_3, window_bounds = array<i64: 2, 128, 384>}, {pipeline_mode = #tpu.pipeline_mode<synchronous>, transform_indices = @transform_4, window_bounds = array<i64: 2, 128, 128>}, {pipeline_mode = #tpu.pipeline_mode<synchronous>, transform_indices = @transform_5, window_bounds = array<i64: 2, 1, 128>}, {pipeline_mode = #tpu.pipeline_mode<synchronous>, transform_indices = @transform_6, window_bounds = array<i64: 2, 128, 128>}, {pipeline_mode = #tpu.pipeline_mode<synchronous>, transform_indices = @transform_7, window_bounds = array<i64: 2, 1, 128>}, {pipeline_mode = #tpu.pipeline_mode<synchronous>, transform_indices = @transform_8, window_bounds = array<i64: 2, 128, 128>}, {pipeline_mode = #tpu.pipeline_mode<synchronous>, transform_indices = @transform_9, window_bounds = array<i64: 2, 1, 128>}, {transform_indices = @transform_10, window_bounds = array<i64: 2, 8, 128>}, {transform_indices = @transform_11, window_bounds = array<i64: 2, 1, 128>}]} {
    %c0 = arith.constant 0 : index
    %c0_0 = arith.constant 0 : index
    %c0_1 = arith.constant 0 : index
    %0 = vector.load %arg1[%c0, %c0_0, %c0_1] : memref<2x8x2xf32, #tpu.memory_space<vmem>>, vector<2x8x2xf32>
    %c0_2 = arith.constant 0 : index
    %c0_3 = arith.constant 0 : index
    %1 = vector.load %arg2[%c0_2, %c0_3] : memref<2x128xf32, #tpu.memory_space<vmem>>, vector<2x128xf32>
    %cst = arith.constant 0.000000e+00 : f32
    %2 = vector.broadcast %cst : f32 to vector<2x8x128xf32>
    %c0_4 = arith.constant 0 : index
    %c0_5 = arith.constant 0 : index
    %3 = vector.load %arg3[%c0_4, %c0_5] : memref<1x128xf32, #tpu.memory_space<vmem>>, vector<1x128xf32>
    %4 = vector.shape_cast %3 : vector<1x128xf32> to vector<1x1x128xf32>
    %5 = vector.broadcast %4 : vector<1x1x128xf32> to vector<2x8x128xf32>
    %6 = arith.addf %2, %5 : vector<2x8x128xf32>
    %7 = vector.extract_strided_slice %0 {offsets = [0, 0, 0], sizes = [2, 8, 1], strides = [1, 1, 1]} : vector<2x8x2xf32> to vector<2x8x1xf32>
    %8 = vector.extract_strided_slice %1 {offsets = [0, 0], sizes = [1, 128], strides = [1, 1]} : vector<2x128xf32> to vector<1x128xf32>
    %9 = vector.shape_cast %8 : vector<1x128xf32> to vector<1x1x128xf32>
    %10 = vector.broadcast %7 : vector<2x8x1xf32> to vector<2x8x128xf32>
    %11 = vector.broadcast %9 : vector<1x1x128xf32> to vector<2x8x128xf32>
    %12 = arith.mulf %10, %11 : vector<2x8x128xf32>
    %13 = arith.addf %6, %12 : vector<2x8x128xf32>
    %14 = vector.extract_strided_slice %0 {offsets = [0, 0, 1], sizes = [2, 8, 1], strides = [1, 1, 1]} : vector<2x8x2xf32> to vector<2x8x1xf32>
    %15 = vector.extract_strided_slice %1 {offsets = [1, 0], sizes = [1, 128], strides = [1, 1]} : vector<2x128xf32> to vector<1x128xf32>
    %16 = vector.shape_cast %15 : vector<1x128xf32> to vector<1x1x128xf32>
    %17 = vector.broadcast %14 : vector<2x8x1xf32> to vector<2x8x128xf32>
    %18 = vector.broadcast %16 : vector<1x1x128xf32> to vector<2x8x128xf32>
    %19 = arith.mulf %17, %18 : vector<2x8x128xf32>
    %20 = arith.addf %13, %19 : vector<2x8x128xf32>
    %21 = vector.shape_cast %20 : vector<2x8x128xf32> to vector<16x128xf32>
    %22 = arith.truncf %21 : vector<16x128xf32> to vector<16x128xbf16>
    %c0_6 = arith.constant 0 : index
    %c0_7 = arith.constant 0 : index
    %c0_8 = arith.constant 0 : index
    %23 = vector.load %arg4[%c0_6, %c0_7, %c0_8] : memref<2x128x384xbf16, #tpu.memory_space<vmem>>, vector<1x128x384xbf16>
    %24 = vector.shape_cast %23 : vector<1x128x384xbf16> to vector<128x384xbf16>
    %cst_9 = arith.constant dense<0.000000e+00> : vector<16x384xf32>
    %25 = tpu.matmul %22, %24, %cst_9 {dimension_numbers = #tpu.dot_dimension_numbers<[1], [0], [0], [1], [0, 0, 1, 1], [], []>} : vector<16x128xbf16>, vector<128x384xbf16>, vector<16x384xf32> -> vector<16x384xf32>
    %26 = vector.extract_strided_slice %25 {offsets = [0, 0], sizes = [16, 128], strides = [1, 1]} : vector<16x384xf32> to vector<16x128xf32>
    %27 = vector.shape_cast %26 : vector<16x128xf32> to vector<2x8x128xf32>
    %28 = arith.truncf %27 : vector<2x8x128xf32> to vector<2x8x128xbf16>
    %29 = vector.extract_strided_slice %25 {offsets = [0, 128], sizes = [16, 128], strides = [1, 1]} : vector<16x384xf32> to vector<16x128xf32>
    %30 = vector.shape_cast %29 : vector<16x128xf32> to vector<2x8x128xf32>
    %31 = arith.truncf %30 : vector<2x8x128xf32> to vector<2x8x128xbf16>
    %32 = vector.extract_strided_slice %25 {offsets = [0, 256], sizes = [16, 128], strides = [1, 1]} : vector<16x384xf32> to vector<16x128xf32>
    %33 = vector.shape_cast %32 : vector<16x128xf32> to vector<2x8x128xf32>
    %34 = arith.truncf %33 : vector<2x8x128xf32> to vector<2x8x128xbf16>
    "tpu.trace_start"() <{level = 10 : i32, message = "bqd,bkd->bqk"}> : () -> ()
    %cst_10 = arith.constant dense<0.000000e+00> : vector<2x8x8xf32>
    %35 = tpu.matmul %28, %31, %cst_10 {dimension_numbers = #tpu.dot_dimension_numbers<[2], [2], [1], [1], [0, 0, 0, 1, 1, 1], [0], [0]>} : vector<2x8x128xbf16>, vector<2x8x128xbf16>, vector<2x8x8xf32> -> vector<2x8x8xf32>
    "tpu.trace_stop"() : () -> ()
    %cst_11 = arith.constant dense<0xFF800000> : vector<2x8xf32>
    %36 = vector.multi_reduction <maximumf>, %35, %cst_11 [2] : vector<2x8x8xf32> to vector<2x8xf32>
    %37 = vector.shape_cast %36 : vector<2x8xf32> to vector<2x8x1xf32>
    %38 = vector.broadcast %37 : vector<2x8x1xf32> to vector<2x8x8xf32>
    %39 = arith.subf %35, %38 : vector<2x8x8xf32>
    %40 = math.exp %39 : vector<2x8x8xf32>
    %cst_12 = arith.constant dense<0.000000e+00> : vector<2x8xf32>
    %41 = vector.multi_reduction <add>, %40, %cst_12 [2] : vector<2x8x8xf32> to vector<2x8xf32>
    %42 = vector.shape_cast %41 : vector<2x8xf32> to vector<2x8x1xf32>
    %43 = tpu.reciprocal %42 {approx = true} : vector<2x8x1xf32> -> vector<2x8x1xf32>
    %44 = vector.broadcast %43 : vector<2x8x1xf32> to vector<2x8x8xf32>
    %45 = arith.mulf %40, %44 : vector<2x8x8xf32>
    %46 = arith.truncf %45 : vector<2x8x8xf32> to vector<2x8x8xbf16>
    "tpu.trace_start"() <{level = 10 : i32, message = "bqk,bkd->bqd"}> : () -> ()
    %cst_13 = arith.constant dense<0.000000e+00> : vector<2x8x128xf32>
    %47 = tpu.matmul %46, %34, %cst_13 {dimension_numbers = #tpu.dot_dimension_numbers<[2], [1], [1], [2], [0, 0, 0, 1, 1, 2], [0], [0]>} : vector<2x8x8xbf16>, vector<2x8x128xbf16>, vector<2x8x128xf32> -> vector<2x8x128xf32>
    "tpu.trace_stop"() : () -> ()
    %48 = vector.shape_cast %47 : vector<2x8x128xf32> to vector<16x128xf32>
    %49 = arith.truncf %48 : vector<16x128xf32> to vector<16x128xbf16>
    %c0_14 = arith.constant 0 : index
    %c0_15 = arith.constant 0 : index
    %c0_16 = arith.constant 0 : index
    %50 = vector.load %arg5[%c0_14, %c0_15, %c0_16] : memref<2x128x128xbf16, #tpu.memory_space<vmem>>, vector<1x128x128xbf16>
    %51 = vector.shape_cast %50 : vector<1x128x128xbf16> to vector<128x128xbf16>
    %cst_17 = arith.constant dense<0.000000e+00> : vector<16x128xf32>
    %52 = tpu.matmul %49, %51, %cst_17 {dimension_numbers = #tpu.dot_dimension_numbers<[1], [0], [0], [1], [0, 0, 1, 1], [], []>} : vector<16x128xbf16>, vector<128x128xbf16>, vector<16x128xf32> -> vector<16x128xf32>
    %c0_18 = arith.constant 0 : index
    %c0_19 = arith.constant 0 : index
    %c0_20 = arith.constant 0 : index
    %53 = vector.load %arg6[%c0_18, %c0_19, %c0_20] : memref<2x1x128xf32, #tpu.memory_space<vmem>>, vector<1x1x128xf32>
    %54 = vector.shape_cast %53 : vector<1x1x128xf32> to vector<1x128xf32>
    %55 = vector.broadcast %54 : vector<1x128xf32> to vector<16x128xf32>
    %56 = arith.addf %52, %55 : vector<16x128xf32>
    %57 = arith.addf %21, %56 : vector<16x128xf32>
    %58 = arith.truncf %57 : vector<16x128xf32> to vector<16x128xbf16>
    %c0_21 = arith.constant 0 : index
    %c0_22 = arith.constant 0 : index
    %c0_23 = arith.constant 0 : index
    %59 = vector.load %arg7[%c0_21, %c0_22, %c0_23] : memref<2x128x128xbf16, #tpu.memory_space<vmem>>, vector<1x128x128xbf16>
    %60 = vector.shape_cast %59 : vector<1x128x128xbf16> to vector<128x128xbf16>
    %cst_24 = arith.constant dense<0.000000e+00> : vector<16x128xf32>
    %61 = tpu.matmul %58, %60, %cst_24 {dimension_numbers = #tpu.dot_dimension_numbers<[1], [0], [0], [1], [0, 0, 1, 1], [], []>} : vector<16x128xbf16>, vector<128x128xbf16>, vector<16x128xf32> -> vector<16x128xf32>
    %c0_25 = arith.constant 0 : index
    %c0_26 = arith.constant 0 : index
    %c0_27 = arith.constant 0 : index
    %62 = vector.load %arg8[%c0_25, %c0_26, %c0_27] : memref<2x1x128xf32, #tpu.memory_space<vmem>>, vector<1x1x128xf32>
    %63 = vector.shape_cast %62 : vector<1x1x128xf32> to vector<1x128xf32>
    %64 = vector.broadcast %63 : vector<1x128xf32> to vector<16x128xf32>
    %65 = arith.addf %61, %64 : vector<16x128xf32>
    %cst_28 = arith.constant 0.000000e+00 : f32
    %66 = vector.broadcast %cst_28 : f32 to vector<16x128xf32>
    %67 = arith.maximumf %65, %66 : vector<16x128xf32>
    %68 = arith.truncf %67 : vector<16x128xf32> to vector<16x128xbf16>
    %c0_29 = arith.constant 0 : index
    %c0_30 = arith.constant 0 : index
    %c0_31 = arith.constant 0 : index
    %69 = vector.load %arg9[%c0_29, %c0_30, %c0_31] : memref<2x128x128xbf16, #tpu.memory_space<vmem>>, vector<1x128x128xbf16>
    %70 = vector.shape_cast %69 : vector<1x128x128xbf16> to vector<128x128xbf16>
    %cst_32 = arith.constant dense<0.000000e+00> : vector<16x128xf32>
    %71 = tpu.matmul %68, %70, %cst_32 {dimension_numbers = #tpu.dot_dimension_numbers<[1], [0], [0], [1], [0, 0, 1, 1], [], []>} : vector<16x128xbf16>, vector<128x128xbf16>, vector<16x128xf32> -> vector<16x128xf32>
    %c0_33 = arith.constant 0 : index
    %c0_34 = arith.constant 0 : index
    %c0_35 = arith.constant 0 : index
    %72 = vector.load %arg10[%c0_33, %c0_34, %c0_35] : memref<2x1x128xf32, #tpu.memory_space<vmem>>, vector<1x1x128xf32>
    %73 = vector.shape_cast %72 : vector<1x1x128xf32> to vector<1x128xf32>
    %74 = vector.broadcast %73 : vector<1x128xf32> to vector<16x128xf32>
    %75 = arith.addf %71, %74 : vector<16x128xf32>
    %76 = arith.addf %57, %75 : vector<16x128xf32>
    %77 = arith.truncf %76 : vector<16x128xf32> to vector<16x128xbf16>
    %c1 = arith.constant 1 : index
    %c0_36 = arith.constant 0 : index
    %c0_37 = arith.constant 0 : index
    %78 = vector.load %arg4[%c1, %c0_36, %c0_37] : memref<2x128x384xbf16, #tpu.memory_space<vmem>>, vector<1x128x384xbf16>
    %79 = vector.shape_cast %78 : vector<1x128x384xbf16> to vector<128x384xbf16>
    %cst_38 = arith.constant dense<0.000000e+00> : vector<16x384xf32>
    %80 = tpu.matmul %77, %79, %cst_38 {dimension_numbers = #tpu.dot_dimension_numbers<[1], [0], [0], [1], [0, 0, 1, 1], [], []>} : vector<16x128xbf16>, vector<128x384xbf16>, vector<16x384xf32> -> vector<16x384xf32>
    %81 = vector.extract_strided_slice %80 {offsets = [0, 0], sizes = [16, 128], strides = [1, 1]} : vector<16x384xf32> to vector<16x128xf32>
    %82 = vector.shape_cast %81 : vector<16x128xf32> to vector<2x8x128xf32>
    %83 = arith.truncf %82 : vector<2x8x128xf32> to vector<2x8x128xbf16>
    %84 = vector.extract_strided_slice %80 {offsets = [0, 128], sizes = [16, 128], strides = [1, 1]} : vector<16x384xf32> to vector<16x128xf32>
    %85 = vector.shape_cast %84 : vector<16x128xf32> to vector<2x8x128xf32>
    %86 = arith.truncf %85 : vector<2x8x128xf32> to vector<2x8x128xbf16>
    %87 = vector.extract_strided_slice %80 {offsets = [0, 256], sizes = [16, 128], strides = [1, 1]} : vector<16x384xf32> to vector<16x128xf32>
    %88 = vector.shape_cast %87 : vector<16x128xf32> to vector<2x8x128xf32>
    %89 = arith.truncf %88 : vector<2x8x128xf32> to vector<2x8x128xbf16>
    "tpu.trace_start"() <{level = 10 : i32, message = "bqd,bkd->bqk"}> : () -> ()
    %cst_39 = arith.constant dense<0.000000e+00> : vector<2x8x8xf32>
    %90 = tpu.matmul %83, %86, %cst_39 {dimension_numbers = #tpu.dot_dimension_numbers<[2], [2], [1], [1], [0, 0, 0, 1, 1, 1], [0], [0]>} : vector<2x8x128xbf16>, vector<2x8x128xbf16>, vector<2x8x8xf32> -> vector<2x8x8xf32>
    "tpu.trace_stop"() : () -> ()
    %cst_40 = arith.constant dense<0xFF800000> : vector<2x8xf32>
    %91 = vector.multi_reduction <maximumf>, %90, %cst_40 [2] : vector<2x8x8xf32> to vector<2x8xf32>
    %92 = vector.shape_cast %91 : vector<2x8xf32> to vector<2x8x1xf32>
    %93 = vector.broadcast %92 : vector<2x8x1xf32> to vector<2x8x8xf32>
    %94 = arith.subf %90, %93 : vector<2x8x8xf32>
    %95 = math.exp %94 : vector<2x8x8xf32>
    %cst_41 = arith.constant dense<0.000000e+00> : vector<2x8xf32>
    %96 = vector.multi_reduction <add>, %95, %cst_41 [2] : vector<2x8x8xf32> to vector<2x8xf32>
    %97 = vector.shape_cast %96 : vector<2x8xf32> to vector<2x8x1xf32>
    %98 = tpu.reciprocal %97 {approx = true} : vector<2x8x1xf32> -> vector<2x8x1xf32>
    %99 = vector.broadcast %98 : vector<2x8x1xf32> to vector<2x8x8xf32>
    %100 = arith.mulf %95, %99 : vector<2x8x8xf32>
    %101 = arith.truncf %100 : vector<2x8x8xf32> to vector<2x8x8xbf16>
    "tpu.trace_start"() <{level = 10 : i32, message = "bqk,bkd->bqd"}> : () -> ()
    %cst_42 = arith.constant dense<0.000000e+00> : vector<2x8x128xf32>
    %102 = tpu.matmul %101, %89, %cst_42 {dimension_numbers = #tpu.dot_dimension_numbers<[2], [1], [1], [2], [0, 0, 0, 1, 1, 2], [0], [0]>} : vector<2x8x8xbf16>, vector<2x8x128xbf16>, vector<2x8x128xf32> -> vector<2x8x128xf32>
    "tpu.trace_stop"() : () -> ()
    %103 = vector.shape_cast %102 : vector<2x8x128xf32> to vector<16x128xf32>
    %104 = arith.truncf %103 : vector<16x128xf32> to vector<16x128xbf16>
    %c1_43 = arith.constant 1 : index
    %c0_44 = arith.constant 0 : index
    %c0_45 = arith.constant 0 : index
    %105 = vector.load %arg5[%c1_43, %c0_44, %c0_45] : memref<2x128x128xbf16, #tpu.memory_space<vmem>>, vector<1x128x128xbf16>
    %106 = vector.shape_cast %105 : vector<1x128x128xbf16> to vector<128x128xbf16>
    %cst_46 = arith.constant dense<0.000000e+00> : vector<16x128xf32>
    %107 = tpu.matmul %104, %106, %cst_46 {dimension_numbers = #tpu.dot_dimension_numbers<[1], [0], [0], [1], [0, 0, 1, 1], [], []>} : vector<16x128xbf16>, vector<128x128xbf16>, vector<16x128xf32> -> vector<16x128xf32>
    %c1_47 = arith.constant 1 : index
    %c0_48 = arith.constant 0 : index
    %c0_49 = arith.constant 0 : index
    %108 = vector.load %arg6[%c1_47, %c0_48, %c0_49] : memref<2x1x128xf32, #tpu.memory_space<vmem>>, vector<1x1x128xf32>
    %109 = vector.shape_cast %108 : vector<1x1x128xf32> to vector<1x128xf32>
    %110 = vector.broadcast %109 : vector<1x128xf32> to vector<16x128xf32>
    %111 = arith.addf %107, %110 : vector<16x128xf32>
    %112 = arith.addf %76, %111 : vector<16x128xf32>
    %113 = arith.truncf %112 : vector<16x128xf32> to vector<16x128xbf16>
    %c1_50 = arith.constant 1 : index
    %c0_51 = arith.constant 0 : index
    %c0_52 = arith.constant 0 : index
    %114 = vector.load %arg7[%c1_50, %c0_51, %c0_52] : memref<2x128x128xbf16, #tpu.memory_space<vmem>>, vector<1x128x128xbf16>
    %115 = vector.shape_cast %114 : vector<1x128x128xbf16> to vector<128x128xbf16>
    %cst_53 = arith.constant dense<0.000000e+00> : vector<16x128xf32>
    %116 = tpu.matmul %113, %115, %cst_53 {dimension_numbers = #tpu.dot_dimension_numbers<[1], [0], [0], [1], [0, 0, 1, 1], [], []>} : vector<16x128xbf16>, vector<128x128xbf16>, vector<16x128xf32> -> vector<16x128xf32>
    %c1_54 = arith.constant 1 : index
    %c0_55 = arith.constant 0 : index
    %c0_56 = arith.constant 0 : index
    %117 = vector.load %arg8[%c1_54, %c0_55, %c0_56] : memref<2x1x128xf32, #tpu.memory_space<vmem>>, vector<1x1x128xf32>
    %118 = vector.shape_cast %117 : vector<1x1x128xf32> to vector<1x128xf32>
    %119 = vector.broadcast %118 : vector<1x128xf32> to vector<16x128xf32>
    %120 = arith.addf %116, %119 : vector<16x128xf32>
    %cst_57 = arith.constant 0.000000e+00 : f32
    %121 = vector.broadcast %cst_57 : f32 to vector<16x128xf32>
    %122 = arith.maximumf %120, %121 : vector<16x128xf32>
    %123 = arith.truncf %122 : vector<16x128xf32> to vector<16x128xbf16>
    %c1_58 = arith.constant 1 : index
    %c0_59 = arith.constant 0 : index
    %c0_60 = arith.constant 0 : index
    %124 = vector.load %arg9[%c1_58, %c0_59, %c0_60] : memref<2x128x128xbf16, #tpu.memory_space<vmem>>, vector<1x128x128xbf16>
    %125 = vector.shape_cast %124 : vector<1x128x128xbf16> to vector<128x128xbf16>
    %cst_61 = arith.constant dense<0.000000e+00> : vector<16x128xf32>
    %126 = tpu.matmul %123, %125, %cst_61 {dimension_numbers = #tpu.dot_dimension_numbers<[1], [0], [0], [1], [0, 0, 1, 1], [], []>} : vector<16x128xbf16>, vector<128x128xbf16>, vector<16x128xf32> -> vector<16x128xf32>
    %c1_62 = arith.constant 1 : index
    %c0_63 = arith.constant 0 : index
    %c0_64 = arith.constant 0 : index
    %127 = vector.load %arg10[%c1_62, %c0_63, %c0_64] : memref<2x1x128xf32, #tpu.memory_space<vmem>>, vector<1x1x128xf32>
    %128 = vector.shape_cast %127 : vector<1x1x128xf32> to vector<1x128xf32>
    %129 = vector.broadcast %128 : vector<1x128xf32> to vector<16x128xf32>
    %130 = arith.addf %126, %129 : vector<16x128xf32>
    %131 = arith.addf %112, %130 : vector<16x128xf32>
    %132 = vector.shape_cast %131 : vector<16x128xf32> to vector<2x8x128xf32>
    %c0_65 = arith.constant 0 : index
    %c0_66 = arith.constant 0 : index
    %c0_67 = arith.constant 0 : index
    %133 = vector.load %arg11[%c0_65, %c0_66, %c0_67] : memref<2x8x128xf32, #tpu.memory_space<vmem>>, vector<2x8x128xf32>
    tpu.vector_store %arg11[%c0_65, %c0_66, %c0_67], %132 {strides = array<i32>} : memref<2x8x128xf32, #tpu.memory_space<vmem>>, vector<2x8x128xf32>,
    %cst_68 = arith.constant dense<0.000000e+00> : vector<2x128xf32>
    %134 = vector.multi_reduction <add>, %132, %cst_68 [1] : vector<2x8x128xf32> to vector<2x128xf32>
    %135 = vector.shape_cast %134 : vector<2x128xf32> to vector<2x1x128xf32>
    %cst_69 = arith.constant 1.250000e-01 : f32
    %136 = vector.broadcast %cst_69 : f32 to vector<2x1x128xf32>
    %137 = arith.mulf %135, %136 : vector<2x1x128xf32>
    %c0_70 = arith.constant 0 : index
    %c0_71 = arith.constant 0 : index
    %c0_72 = arith.constant 0 : index
    %138 = vector.load %arg12[%c0_70, %c0_71, %c0_72] : memref<2x1x128xf32, #tpu.memory_space<vmem>>, vector<2x1x128xf32>
    tpu.vector_store %arg12[%c0_70, %c0_71, %c0_72], %137 {strides = array<i32>} : memref<2x1x128xf32, #tpu.memory_space<vmem>>, vector<2x1x128xf32>,
    return
  }
  func.func @transform_0(%arg0: i32) -> (i32, i32, i32) {
    %c0_i32 = arith.constant 0 : i32
    %c0_i32_0 = arith.constant 0 : i32
    %c0_i32_1 = arith.constant 0 : i32
    return %arg0, %c0_i32, %c0_i32_0 : i32, i32, i32
  }
  func.func @transform_1(%arg0: i32) -> (i32, i32) {
    %c0_i32 = arith.constant 0 : i32
    %c0_i32_0 = arith.constant 0 : i32
    %c0_i32_1 = arith.constant 0 : i32
    return %c0_i32, %c0_i32_0 : i32, i32
  }
  func.func @transform_2(%arg0: i32) -> (i32, i32) {
    %c0_i32 = arith.constant 0 : i32
    %c0_i32_0 = arith.constant 0 : i32
    %c0_i32_1 = arith.constant 0 : i32
    return %c0_i32, %c0_i32_0 : i32, i32
  }
  func.func @transform_3(%arg0: i32) -> (i32, i32, i32) {
    %c0_i32 = arith.constant 0 : i32
    %c0_i32_0 = arith.constant 0 : i32
    %c0_i32_1 = arith.constant 0 : i32
    %c0_i32_2 = arith.constant 0 : i32
    return %c0_i32, %c0_i32_0, %c0_i32_1 : i32, i32, i32
  }
  func.func @transform_4(%arg0: i32) -> (i32, i32, i32) {
    %c0_i32 = arith.constant 0 : i32
    %c0_i32_0 = arith.constant 0 : i32
    %c0_i32_1 = arith.constant 0 : i32
    %c0_i32_2 = arith.constant 0 : i32
    return %c0_i32, %c0_i32_0, %c0_i32_1 : i32, i32, i32
  }
  func.func @transform_5(%arg0: i32) -> (i32, i32, i32) {
    %c0_i32 = arith.constant 0 : i32
    %c0_i32_0 = arith.constant 0 : i32
    %c0_i32_1 = arith.constant 0 : i32
    %c0_i32_2 = arith.constant 0 : i32
    return %c0_i32, %c0_i32_0, %c0_i32_1 : i32, i32, i32
  }
  func.func @transform_6(%arg0: i32) -> (i32, i32, i32) {
    %c0_i32 = arith.constant 0 : i32
    %c0_i32_0 = arith.constant 0 : i32
    %c0_i32_1 = arith.constant 0 : i32
    %c0_i32_2 = arith.constant 0 : i32
    return %c0_i32, %c0_i32_0, %c0_i32_1 : i32, i32, i32
  }
  func.func @transform_7(%arg0: i32) -> (i32, i32, i32) {
    %c0_i32 = arith.constant 0 : i32
    %c0_i32_0 = arith.constant 0 : i32
    %c0_i32_1 = arith.constant 0 : i32
    %c0_i32_2 = arith.constant 0 : i32
    return %c0_i32, %c0_i32_0, %c0_i32_1 : i32, i32, i32
  }
  func.func @transform_8(%arg0: i32) -> (i32, i32, i32) {
    %c0_i32 = arith.constant 0 : i32
    %c0_i32_0 = arith.constant 0 : i32
    %c0_i32_1 = arith.constant 0 : i32
    %c0_i32_2 = arith.constant 0 : i32
    return %c0_i32, %c0_i32_0, %c0_i32_1 : i32, i32, i32
  }
  func.func @transform_9(%arg0: i32) -> (i32, i32, i32) {
    %c0_i32 = arith.constant 0 : i32
    %c0_i32_0 = arith.constant 0 : i32
    %c0_i32_1 = arith.constant 0 : i32
    %c0_i32_2 = arith.constant 0 : i32
    return %c0_i32, %c0_i32_0, %c0_i32_1 : i32, i32, i32
  }
  func.func @transform_10(%arg0: i32) -> (i32, i32, i32) {
    %c0_i32 = arith.constant 0 : i32
    %c0_i32_0 = arith.constant 0 : i32
    %c0_i32_1 = arith.constant 0 : i32
    return %arg0, %c0_i32, %c0_i32_0 : i32, i32, i32
  }
  func.func @transform_11(%arg0: i32) -> (i32, i32, i32) {
    %c0_i32 = arith.constant 0 : i32
    %c0_i32_0 = arith.constant 0 : i32
    %c0_i32_1 = arith.constant 0 : i32
    return %arg0, %c0_i32, %c0_i32_0 : i32, i32, i32
  }
}

</mosaic_0001>

<bundles_post_ra>
// kernel: tpu_custom_call.1
= control target key start
LH: loop header
LB: loop body
LE: loop exit
PB: predicated region body
PF: predicated region fallthrough
CT: control target
= control target key end

     0   :  { %17 = vsyncpa [#allocation3], 0  ;;  %s2834_s0 = inlined_call_operand.vmem [shape: f32[2,8,2], index: 0, kind: input, shape index: {}]   ;;  %s2835_s1 = inlined_call_operand.vmem [shape: f32[2,128], index: 1, kind: input, shape index: {}]   ;;  %s2836_s2 = inlined_call_operand.vmem [shape: f32[1,128], index: 2, kind: input, shape index: {}]   ;;  %s2837_s3 = inlined_call_operand.hbm [shape: bf16[2,128,384], index: 3, kind: input, shape index: {}]   ;;  %s2838_s4 = inlined_call_operand.hbm [shape: bf16[2,128,128], index: 4, kind: input, shape index: {}]   ;;  %s2839_s5 = inlined_call_operand.vmem [shape: f32[2,1,128], index: 5, kind: input, shape index: {}]   ;;  %s2840_s6 = inlined_call_operand.hbm [shape: bf16[2,128,128], index: 6, kind: input, shape index: {}]   ;;  %s2841_s7 = inlined_call_operand.vmem [shape: f32[2,1,128], index: 7, kind: input, shape index: {}]   ;;  %s2842_s8 = inlined_call_operand.hbm [shape: bf16[2,128,128], index: 8, kind: input, shape index: {}]   ;;  %s2843_s9 = inlined_call_operand.vmem [shape: f32[2,1,128], index: 9, kind: input, shape index: {}]   ;;  %s2844_s10 = inlined_call_operand.hbm [shape: f32[2,8,128], index: 10, kind: output, shape index: {0}]   ;;  %s2845_s11 = inlined_call_operand.hbm [shape: f32[2,1,128], index: 11, kind: output, shape index: {1}]  }
   0x1   :  { %18 = vsyncpa [#allocation6], 0 }
   0x2   :  { %19 = vsyncpa [#allocation9], 0 }
   0x3   :  { %20 = vsyncpa [#allocation4], 0 }
   0x4   :  { %21 = vsyncpa [#allocation12], 0  ;;  %s2483_s17 = smov [#allocation5]   ;;  %s2341_s21 = scalar_lea.hbm %s2838_s4, 2048 }
   0x5   :  { %s45_s18 = sshll.u32 %s2483_s17, 4  ;;  %p2342_p0 = scmp.ne.s32.totalorder %s2838_s4, %s2341_s21  ;;  %s46_s18 = int_to_ptr.vmem [resolvable:$true] %s45_s18 }
   0x6   :  { %p2345_p1 = scmp.lt.u32.totalorder %s2341_s21, %s2838_s4 }
   0x8   :  { %p2347_p2 = pnand %p2345_p1, %p2342_p0 }
   0xa   :  { %2350 = shalt.err (!%p2347_p2)
}
   0xb   :  { %s2351_s26 = scalar_lea.vmem %s46_s18, 2048  ;;  %p2356_p4 = scmp.lt.s32.totalorder %s46_s18, %s46_s18 }
   0xc   :  { %p2352_p3 = scmp.ne.s32.totalorder %s46_s18, %s2351_s26  ;;  %p2357_p5 = scmp.lt.s32.totalorder %s2351_s26, %s2351_s26 }
   0xe   :  { %p2358_p6 = por %p2357_p5, %p2356_p4 }
  0x10   :  { %p2359_p7 = pnand %p2358_p6, %p2352_p3 }
  0x12   :  { %2362 = shalt.err (!%p2359_p7)
}
  0x13   :  { %s2484_s27 = smov 64   ;;  %s2485_s28 = smov 4  }
  0x14   :  { %51 = dma.hbm_to_vmem [thread:$0]  %s2838_s4, 2048, %s46_s18, [#allocation6], %s2484_s27, %s2484_s27, %s2485_s28  }
  0x15   :  { %s2486_s12 = smov [#allocation2]   ;;  %s2363_s16 = scalar_lea.hbm %s2837_s3, 6144 }
  0x16   :  { %s33_s13 = sshll.u32 %s2486_s12, 4  ;;  %p2364_p8 = scmp.ne.s32.totalorder %s2837_s3, %s2363_s16  ;;  %s34_s13 = int_to_ptr.vmem [resolvable:$true] %s33_s13 }
  0x17   :  { %p2367_p9 = scmp.lt.u32.totalorder %s2363_s16, %s2837_s3 }
  0x19   :  { %p2369_p10 = pnand %p2367_p9, %p2364_p8 }
  0x1b   :  { %2372 = shalt.err (!%p2369_p10)
}
  0x1c   :  { %s2373_s22 = scalar_lea.vmem %s34_s13, 6144  ;;  %p2378_p12 = scmp.lt.s32.totalorder %s34_s13, %s34_s13 }
  0x1d   :  { %p2374_p11 = scmp.ne.s32.totalorder %s34_s13, %s2373_s22  ;;  %p2379_p13 = scmp.lt.s32.totalorder %s2373_s22, %s2373_s22 }
  0x1f   :  { %p2380_p0 = por %p2379_p13, %p2378_p12 }
  0x21   :  { %p2381_p1 = pnand %p2380_p0, %p2374_p11 }
  0x23   :  { %2384 = shalt.err (!%p2381_p1)
}
  0x24   :  { %s2487_s4 = smov 192   ;;  %s2488_s18 = smov 12  }
  0x25   :  { %39 = dma.hbm_to_vmem [thread:$0]  %s2837_s3, 6144, %s34_s13, [#allocation3], %s2487_s4, %s2487_s4, %s2488_s18  }
  0x26   :  { %s2489_s25 = smov [#allocation7]   ;;  %s2490_s29 = smov [#allocation8]  }
  0x27   :  { %s59_s26 = sshll.u32 %s2489_s25, 4  ;;  %s73_s30 = sshll.u32 %s2490_s29, 4  ;;  %s60_s26 = int_to_ptr.vmem [resolvable:$true] %s59_s26  ;;  %s2588_s30 = int_to_ptr.vmem [resolvable:$true] %s73_s30 }
  0x28   :  { %s2385_s15 = scalar_lea.hbm %s2840_s6, 2048 }
  0x29   :  { %p2386_p2 = scmp.ne.s32.totalorder %s2840_s6, %s2385_s15  ;;  %p2389_p3 = scmp.lt.u32.totalorder %s2385_s15, %s2840_s6 }
  0x2b   :  { %p2391_p4 = pnand %p2389_p3, %p2386_p2 }
  0x2d   :  { %2394 = shalt.err (!%p2391_p4)
}
  0x2e   :  { %s2395_s3 = scalar_lea.vmem %s60_s26, 2048  ;;  %p2400_p6 = scmp.lt.s32.totalorder %s60_s26, %s60_s26 }
  0x2f   :  { %p2396_p5 = scmp.ne.s32.totalorder %s60_s26, %s2395_s3  ;;  %p2401_p7 = scmp.lt.s32.totalorder %s2395_s3, %s2395_s3 }
  0x31   :  { %p2402_p8 = por %p2401_p7, %p2400_p6 }
  0x33   :  { %p2403_p9 = pnand %p2402_p8, %p2396_p5 }
  0x35   :  { %2406 = shalt.err (!%p2403_p9)
}
  0x36   :  { %65 = dma.hbm_to_vmem [thread:$0]  %s2840_s6, 2048, %s60_s26, [#allocation6], %s2484_s27, %s2484_s27, %s2485_s28  }
  0x37   :  { %s2407_s18 = scalar_lea.hbm %s2842_s8, 2048 }
  0x38   :  { %p2408_p10 = scmp.ne.s32.totalorder %s2842_s8, %s2407_s18  ;;  %p2411_p11 = scmp.lt.u32.totalorder %s2407_s18, %s2842_s8 }
  0x3a   :  { %p2413_p12 = pnand %p2411_p11, %p2408_p10 }
  0x3c   :  { %2416 = shalt.err (!%p2413_p12)
}
  0x3d   :  { %s2417_s12 = scalar_lea.vmem %s2588_s30, 2048  ;;  %p2422_p0 = scmp.lt.s32.totalorder %s2588_s30, %s2588_s30 }
  0x3e   :  { %p2418_p13 = scmp.ne.s32.totalorder %s2588_s30, %s2417_s12  ;;  %p2423_p1 = scmp.lt.s32.totalorder %s2417_s12, %s2417_s12 }
  0x40   :  { %p2424_p2 = por %p2423_p1, %p2422_p0 }
  0x42   :  { %p2425_p3 = pnand %p2424_p2, %p2418_p13 }
  0x44   :  { %2428 = shalt.err (!%p2425_p3)
}
  0x45   :  { %79 = dma.hbm_to_vmem [thread:$0]  %s2842_s8, 2048, %s2588_s30, [#allocation9], %s2484_s27, %s2484_s27, %s2485_s28  }
  0x46   :  { %2473 = dma.done.wait [#allocation3], 6144  }
  0x47   :  { %2474 = vsyncadd [#allocation3], 4294961152 }
  0x48   :  { %2475 = dma.done.wait [#allocation6], 4096  }
  0x49   :  { %2476 = vsyncadd [#allocation6], 4294963200 }
  0x4a   :  { %2477 = dma.done.wait [#allocation9], 2048  }
  0x4b   :  { %2478 = vsyncadd [#allocation9], 4294965248  ;;  %v2491_v0 = vmov 1   ;;  %v2492_v1 = vmov 0   ;;  %v2493_v2 = vmov 0.0   ;;  %v95_v3 = vld [vmem:[%s2834_s0] sm:$0xff]  ;;  %v116_v29 = vlaneseq }
  0x4c   :  { %2211 = vset.pattern.permute.xlu1 %v2491_v0  ;;  %2210 = vset.pattern.permute.xlu0 %v2492_v1  ;;  %v96_v4 = vld [vmem:[%s2834_s0 + $0x8] sm:$0xff]  ;;  %v2213_v5 = vld [vmem:[#allocation2 + $0x4] ss:$12 sps:$4 sm:$0xff]   ;;  %v2215_v6 = vld [vmem:[#allocation2] ss:$12 sps:$4 sm:$0xff]   ;;  %vm2494_vm0 = vmmov 0  }
  0x4d   :  { %1984 = vmatprep.subr.bf16.mxu1 %v2493_v2  ;;  %333 = vmatprep.mubr.bf16.mxu0 %v2492_v1  ;;  %v2216_v7 = vld [vmem:[#allocation2 + $0x8] ss:$12 sps:$4 sm:$0xff]   ;;  %v2219_v9 = vld [vmem:[#allocation2 + $0x18] ss:$12 sps:$4 sm:$0xff]   ;;  %v2220_v10 = vld [vmem:[#allocation2 + $0x20] ss:$12 sps:$4 sm:$0xff]  }
  0x4e   :  { %125 = vperm.xlu1 %2211, %v95_v3   ;;  %108 = vperm.xlu0 %2210, %v95_v3   ;;  %v2217_v8 = vld [vmem:[#allocation2 + $0x1c] ss:$12 sps:$4 sm:$0xff]   ;;  %v2221_v11 = vld [vmem:[#allocation2 + $0x34] ss:$12 sps:$4 sm:$0xff]   ;;  %v2224_v13 = vld [vmem:[#allocation2 + $0x38] ss:$12 sps:$4 sm:$0xff]  }
  0x4f   :  { %301 = vmatprep.subr.bf16.mxu0 %v2213_v5  ;;  %1985 = vmatpush3.bf16.msra.mxu1 %v2216_v7  ;;  %v2223_v12 = vld [vmem:[#allocation2 + $0x30] ss:$12 sps:$4 sm:$0xff]   ;;  %v2225_v14 = vld [vmem:[#allocation2 + $0x4c] ss:$12 sps:$4 sm:$0xff]   ;;  %v2227_v15 = vld [vmem:[#allocation2 + $0x48] ss:$12 sps:$4 sm:$0xff]  }
  0x50   :  { %302 = vmatpush1.bf16.msra.mxu0 %v2215_v6  ;;  %1986 = vmatprep.subr.bf16.mxu1 %v2493_v2  ;;  %v2228_v16 = vld [vmem:[#allocation2 + $0x50] ss:$12 sps:$4 sm:$0xff]   ;;  %v2231_v18 = vld [vmem:[#allocation2 + $0x60] ss:$12 sps:$4 sm:$0xff]   ;;  %v2232_v19 = vld [vmem:[#allocation2 + $0x68] ss:$12 sps:$4 sm:$0xff]  }
  0x51   :  { %303 = vmatprep.subr.bf16.mxu0 %v2217_v8  ;;  %2000 = vmatprep.mubr.msk.bf16.mxu1 %vm2494_vm0, %v2493_v2  ;;  %v2229_v17 = vld [vmem:[#allocation2 + $0x64] ss:$12 sps:$4 sm:$0xff]   ;;  %v2233_v20 = vld [vmem:[#allocation2 + $0x7c] ss:$12 sps:$4 sm:$0xff]   ;;  %v2236_v22 = vld [vmem:[#allocation2 + $0x80] ss:$12 sps:$4 sm:$0xff]  }
  0x52   :  { %129 = vperm.xlu1 %2211, %v96_v4   ;;  %113 = vperm.xlu0 %2210, %v96_v4   ;;  %v2235_v21 = vld [vmem:[#allocation2 + $0x78] ss:$12 sps:$4 sm:$0xff]   ;;  %v2237_v23 = vld [vmem:[#allocation2 + $0x94] ss:$12 sps:$4 sm:$0xff]   ;;  %v2239_v24 = vld [vmem:[#allocation2 + $0x90] ss:$12 sps:$4 sm:$0xff]  }
  0x53   :  { %1987 = vmatpush3.bf16.msra.mxu1 %v2220_v10  ;;  %v2240_v25 = vld [vmem:[#allocation2 + $0x98] ss:$12 sps:$4 sm:$0xff]   ;;  %v2243_v27 = vld [vmem:[#allocation2 + $0xa8] ss:$12 sps:$4 sm:$0xff]   ;;  %v2244_v28 = vld [vmem:[#allocation2 + $0xb0] ss:$12 sps:$4 sm:$0xff]  }
  0x54   :  { %304 = vmatpush1.bf16.msra.mxu0 %v2219_v9  ;;  %1988 = vmatprep.subr.bf16.mxu1 %v2493_v2  ;;  %v2241_v26 = vld [vmem:[#allocation2 + $0xac] ss:$12 sps:$4 sm:$0xff]   ;;  %v117_v30 = vshrl.u32 %v116_v29, 7  ;;  %v97_v32 = vld [vmem:[%s2835_s1] sm:$0x3]  ;;  %vm499_vm1 = vcmask 1043456  }
  0x55   :  { %305 = vmatprep.subr.bf16.mxu0 %v2221_v11  ;;  %v1786_v39 = vld [vmem:[%s2836_s2] ss:$0 sm:$0xff]  ;;  %vm471_vm2 = vcmask 64512   ;;  %s2495_s23 = smov [#allocation10]  }
  0x56   :  { %2212 = vset.pattern.permute.xlu0 %v2491_v0  ;;  %v118_v31 = vsub.s32 0, %v117_v30  ;;  %v134_v33 = vsub.s32 1, %v117_v30 }
  0x57   :  { %1989 = vmatpush3.bf16.msra.mxu1 %v2224_v13 }
  0x58   :  { %306 = vmatpush1.bf16.msra.mxu0 %v2223_v12  ;;  %1990 = vmatprep.subr.bf16.mxu1 %v2493_v2  ;;  %v119_v34 = vrot.slane %v97_v32, %v118_v31  ;;  %v135_v37 = vrot.slane %v97_v32, %v134_v33 }
  0x59   :  { %307 = vmatprep.subr.bf16.mxu0 %v2225_v14 }
  0x5b   :  { %1991 = vmatpush3.bf16.msra.mxu1 %v2228_v16 }
  0x5c   :  { %308 = vmatpush1.bf16.msra.mxu0 %v2227_v15  ;;  %1992 = vmatprep.subr.bf16.mxu1 %v2493_v2 }
  0x5d   :  { %309 = vmatprep.subr.bf16.mxu0 %v2229_v17 }
  0x5f   :  { %1993 = vmatpush3.bf16.msra.mxu1 %v2232_v19 }
  0x60   :  { %310 = vmatpush1.bf16.msra.mxu0 %v2231_v18  ;;  %1994 = vmatprep.subr.bf16.mxu1 %v2493_v2 }
  0x61   :  { %311 = vmatprep.subr.bf16.mxu0 %v2233_v20 }
  0x63   :  { %1995 = vmatpush3.bf16.msra.mxu1 %v2236_v22  ;;  %v2245_v22 = vld [vmem:[#allocation5] sm:$0xff]  }
  0x64   :  { %312 = vmatpush1.bf16.msra.mxu0 %v2235_v21  ;;  %1996 = vmatprep.subr.bf16.mxu1 %v2493_v2 }
  0x65   :  { %313 = vmatprep.subr.bf16.mxu0 %v2237_v23  ;;  %v2246_v23 = vld [vmem:[#allocation5 + $0x8] sm:$0xff]  }
  0x67   :  { %1997 = vmatpush3.bf16.msra.mxu1 %v2240_v25  ;;  %v2248_v25 = vld [vmem:[#allocation5 + $0x18] sm:$0xff]  }
  0x68   :  { %314 = vmatpush1.bf16.msra.mxu0 %v2239_v24  ;;  %1998 = vmatprep.subr.bf16.mxu1 %v2493_v2  ;;  %v2247_v24 = vld [vmem:[#allocation5 + $0x10] sm:$0xff]  }
  0x69   :  { %315 = vmatprep.subr.bf16.mxu0 %v2241_v26  ;;  %v2249_v26 = vld [vmem:[#allocation5 + $0x20] sm:$0xff]  }
  0x6b   :  { %1999 = vmatpush3.bf16.msra.mxu1 %v2244_v28 }
  0x6c   :  { %316 = vmatpush1.bf16.msra.mxu0 %v2243_v27  ;;  %2004 = vmatprep.subr.bf16.mxu1 %v2493_v2 }
  0x6d   :  { %2028 = vmatprep.subr.bf16.mxu0 %v2493_v2 }
  0xcd   :  { %v126_v35 = vpop.permute.xlu1 %125  ;;  %v109_v36 = vpop.permute.xlu0 %108 }
  0xce   :  { %v120_v38 = vmul.f32 %v119_v34, %v109_v36  ;;  %v136_v42 = vmul.f32 %v135_v37, %v126_v35 }
  0xd0   :  { %v122_v43 = vadd.f32 %v1786_v39, %v120_v38  ;;  %v2251_v38 = vld [vmem:[#allocation5 + $0x30] sm:$0xff]  }
  0xd1   :  { %v130_v40 = vpop.permute.xlu1 %129  ;;  %v114_v41 = vpop.permute.xlu0 %113 }
  0xd2   :  { %v121_v44 = vmul.f32 %v119_v34, %v114_v41  ;;  %v137_v45 = vmul.f32 %v135_v37, %v130_v40  ;;  %v2651_v47 = vadd.f32 %v136_v42, %v122_v43  ;;  %v2250_v37 = vld [vmem:[#allocation5 + $0x28] sm:$0xff]   ;;  %v2253_v40 = vld [vmem:[#allocation7] sm:$0xff]   ;;  %v2255_v42 = vld [vmem:[#allocation7 + $0x10] sm:$0xff]  }
  0xd3   :  { %v2254_v41 = vld [vmem:[#allocation7 + $0x8] sm:$0xff]   ;;  %v2256_v43 = vld [vmem:[#allocation7 + $0x18] sm:$0xff]  }
  0xd4   :  { %v123_v46 = vadd.f32 %v1786_v39, %v121_v44  ;;  %v2252_v39 = vld [vmem:[#allocation5 + $0x38] sm:$0xff]   ;;  %v2257_v44 = vld [vmem:[#allocation7 + $0x20] sm:$0xff]  }
  0xd6   :  { %v2653_v48 = vadd.f32 %v137_v45, %v123_v46  ;;  %v2258_v45 = vld [vmem:[#allocation7 + $0x28] sm:$0xff]  }
  0xd8   :  { %v140_v49 = vpack.c.bf16 %v2653_v48, %v2651_v47 }
  0xda   :  { %334 = vmatmul.mubr.bf16.vlgmr.msra.gmra.mrb[0].mxu0 %v140_v49  ;;  %2001 = vmatmul.mubr.bf16.vlgmr.msra.gmra.mrb[0].mxu1 %v140_v49 }
  0xdb   :  { %2006 = vmatprep.mubr.msk.bf16.mxu1 %vm2494_vm0, %v2493_v2  ;;  %2044 = vmatprep.mubr.msk.bf16.mxu0 %vm2494_vm0, %v2493_v2 }
  0xdc   :  { %2029 = vmatpush3.bf16.msra.mxu0 %v2245_v22  ;;  %v2291_v22 = vld [vmem:[#allocation2 + $0x13c] ss:$12 sps:$4 sm:$0xff]  }
  0xdd   :  { %2030 = vmatprep.subr.bf16.mxu0 %v2493_v2 }
  0xe0   :  { %2031 = vmatpush3.bf16.msra.mxu0 %v2246_v23  ;;  %v2289_v23 = vld [vmem:[#allocation2 + $0x138] ss:$12 sps:$4 sm:$0xff]  }
  0xe1   :  { %2032 = vmatprep.subr.bf16.mxu0 %v2493_v2 }
  0xe4   :  { %2033 = vmatpush3.bf16.msra.mxu0 %v2247_v24  ;;  %v1822_v24 = vld [vmem:[%s2841_s7] ss:$0 sm:$0xff] }
  0xe5   :  { %2034 = vmatprep.subr.bf16.mxu0 %v2493_v2 }
  0xe8   :  { %2035 = vmatpush3.bf16.msra.mxu0 %v2248_v25 }
  0xe9   :  { %2036 = vmatprep.subr.bf16.mxu0 %v2493_v2 }
  0xec   :  { %2037 = vmatpush3.bf16.msra.mxu0 %v2249_v26 }
  0xed   :  { %2038 = vmatprep.subr.bf16.mxu0 %v2493_v2 }
  0xf0   :  { %2039 = vmatpush3.bf16.msra.mxu0 %v2250_v37  ;;  %v2284_v37 = vld [vmem:[#allocation2 + $0x110] ss:$12 sps:$4 sm:$0xff]  }
  0xf1   :  { %2040 = vmatprep.subr.bf16.mxu0 %v2493_v2 }
  0xf4   :  { %2041 = vmatpush3.bf16.msra.mxu0 %v2251_v38  ;;  %v2288_v38 = vld [vmem:[#allocation2 + $0x128] ss:$12 sps:$4 sm:$0xff]  }
  0xf5   :  { %2042 = vmatprep.subr.bf16.mxu0 %v2493_v2 }
  0xf8   :  { %2043 = vmatpush3.bf16.msra.mxu0 %v2252_v39  ;;  %v2292_v39 = vld [vmem:[#allocation2 + $0x140] ss:$12 sps:$4 sm:$0xff]  }
  0xf9   :  { %2068 = vmatprep.subr.bf16.mxu0 %v2493_v2 }
 0x1ad   :  { %v335_v50 = vpop.f32.mrb[0].mxu0  ;;  %v378_v51 = vpop.f32.mrb[0].mxu1 }
 0x1ae   :  { %v337_v52 = vpop.f32.mrb[1].mxu0  ;;  %v2002_v53 = vpop.f32.mrb[1].mxu1  ;;  %v385_v59 = vpack.c.bf16 %v335_v50, %v335_v50  ;;  %v389_v61 = vpack.c.bf16 %v378_v51, %v378_v51 }
 0x1af   :  { %v387_v54 = vpack.c.bf16 %v337_v52, %v337_v52  ;;  %v339_v55 = vpop.f32.mrb[2].mxu0  ;;  %v2661_v56 = vpop.f32.mrb[2].mxu1 }
 0x1b0   :  { %v341_v57 = vpop.f32.mrb[3].mxu0  ;;  %v2003_v58 = vpop.f32.mrb[3].mxu1  ;;  %v386_v62 = vpack.c.bf16 %v339_v55, %v339_v55  ;;  %v501_v63 = vsel %vm499_vm1, %v389_v61, 0  ;;  %v390_v30 = vpack.c.bf16 %v2661_v56, %v2661_v56  ;;  %v2263_v61 = vld [vmem:[#allocation8 + $0x10] sm:$0xff]  }
 0x1b1   :  { %2005 = vmatpush3.bf16.xpose.msra.mxu1 %v387_v54  ;;  %v388_v60 = vpack.c.bf16 %v341_v57, %v341_v57  ;;  %v2259_v57 = vld [vmem:[#allocation7 + $0x30] sm:$0xff]   ;;  %v2260_v58 = vld [vmem:[#allocation7 + $0x38] sm:$0xff]  }
 0x1b2   :  { %2010 = vmatprep.subr.bf16.mxu1 %v2493_v2  ;;  %v547_v33 = vsel %vm499_vm1, %v390_v30, 0 }
 0x1b8   :  { %2007 = vmatmul.mubr.bf16.vlgmr.msra.gmra.mrb[4].mxu1 %v385_v59  ;;  %v2261_v59 = vld [vmem:[#allocation8] sm:$0xff]  }
 0x1b9   :  { %2011 = vmatpush3.bf16.xpose.msra.mxu1 %v388_v60  ;;  %2012 = vmatprep.mubr.msk.bf16.mxu1 %vm2494_vm0, %v2493_v2  ;;  %v2262_v60 = vld [vmem:[#allocation8 + $0x8] sm:$0xff]  }
 0x1ba   :  { %2016 = vmatprep.subr.bf16.mxu1 %v2493_v2 }
 0x1c0   :  { %2013 = vmatmul.mubr.bf16.vlgmr.msra.gmra.mrb[8].mxu1 %v386_v62  ;;  %v2264_v62 = vld [vmem:[#allocation8 + $0x18] sm:$0xff]  }
 0x1c1   :  { %2017 = vmatpush3.bf16.msra.mxu1 %v501_v63  ;;  %2018 = vmatprep.mubr.msk.bf16.mxu1 %vm2494_vm0, %v2493_v2  ;;  %v2265_v63 = vld [vmem:[#allocation8 + $0x20] sm:$0xff]  }
 0x1c2   :  { %2022 = vmatprep.subr.bf16.mxu1 %v2493_v2 }
 0x28b   :  { %v425_v0 = vpop.f32.mrb[4].mxu1 }
 0x28c   :  { %v2008_v3 = vpop.f32.mrb[5].mxu1  ;;  %v472_v4 = vsel %vm471_vm2, %v425_v0, -inf }
 0x28d   :  { %473 = vmax.xlane.f32.xlu0 %v472_v4  ;;  %v428_v5 = vpop.f32.mrb[6].mxu1  ;;  %v1813_v3 = vld [vmem:[%s2839_s5] ss:$0 sm:$0xff] }
 0x28e   :  { %v2009_v6 = vpop.f32.mrb[7].mxu1 }
 0x293   :  { %v465_v7 = vpop.f32.mrb[8].mxu1 }
 0x294   :  { %v2014_v8 = vpop.f32.mrb[9].mxu1  ;;  %v475_v9 = vsel %vm471_vm2, %v465_v7, -inf }
 0x295   :  { %476 = vmax.xlane.f32.xlu1 %v475_v9  ;;  %v468_v10 = vpop.f32.mrb[10].mxu1 }
 0x296   :  { %v2015_v11 = vpop.f32.mrb[11].mxu1 }
 0x31a   :  { %v474_v12 = vpop.xlane.xlu0 %473 }
 0x31b   :  { %v478_v13 = vsub.f32 %v425_v0, %v474_v12  ;;  %v2266_v0 = vld [vmem:[#allocation8 + $0x28] sm:$0xff]  }
 0x31d   :  { %v480_v14 = vmul.f32 1.442695, %v478_v13  ;;  %v2267_v13 = vld [vmem:[#allocation8 + $0x30] sm:$0xff]  }
 0x31f   :  { %2325 = vpow2.f32 %v480_v14  ;;  %v2268_v14 = vld [vmem:[#allocation8 + $0x38] sm:$0xff]  }
 0x322   :  { %v477_v15 = vpop.xlane.xlu1 %476 }
 0x323   :  { %v479_v16 = vsub.f32 %v465_v7, %v477_v15  ;;  %v2269_v15 = vld [vmem:[#allocation2 + $0xc0] ss:$12 sps:$4 sm:$0xff]  }
 0x325   :  { %v482_v17 = vmul.f32 1.442695, %v479_v16  ;;  %v2275_v16 = vld [vmem:[#allocation2 + $0xdc] ss:$12 sps:$4 sm:$0xff]  }
 0x327   :  { %2327 = vpow2.f32 %v482_v17  ;;  %v2279_v17 = vld [vmem:[#allocation2 + $0xf4] ss:$12 sps:$4 sm:$0xff]  }
 0x329   :  { %v2326_v18 = vpop.eup %2325 }
 0x32a   :  { %v484_v19 = vsel %vm471_vm2, %v2326_v18, 0.0 }
 0x32b   :  { %485 = vadd.xlane.f32.xlu0 %v484_v19  ;;  %v2281_v19 = vld [vmem:[#allocation2 + $0x108] ss:$12 sps:$4 sm:$0xff]  }
 0x331   :  { %v2328_v20 = vpop.eup %2327 }
 0x332   :  { %v487_v21 = vsel %vm471_vm2, %v2328_v20, 0.0 }
 0x333   :  { %488 = vadd.xlane.f32.xlu0 %v487_v21  ;;  %v2285_v21 = vld [vmem:[#allocation2 + $0x120] ss:$12 sps:$4 sm:$0xff]  }
 0x3b8   :  { %v486_v27 = vpop.xlane.xlu0 %485 }
 0x3b9   :  { %2329 = vrcp.f32 %v486_v27 }
 0x3c0   :  { %v489_v28 = vpop.xlane.xlu0 %488 }
 0x3c1   :  { %2331 = vrcp.f32 %v489_v28 }
 0x3c3   :  { %v2330_v29 = vpop.eup %2329 }
 0x3c4   :  { %v492_v31 = vmul.f32 %v2330_v29, %v2326_v18  ;;  %v2277_v18 = vld [vmem:[#allocation2 + $0xf0] ss:$12 sps:$4 sm:$0xff]  }
 0x3c6   :  { %v494_v32 = vpack.c.bf16 %v492_v31, %v492_v31 }
 0x3c8   :  { %2019 = vmatmul.mubr.msk.bf16.vlgmr.msra.gmra.mrb[12].mxu1 %vm471_vm2, %v494_v32 }
 0x3c9   :  { %2023 = vmatpush3.bf16.msra.mxu1 %v547_v33  ;;  %2024 = vmatprep.mubr.msk.bf16.mxu1 %vm2494_vm0, %v2493_v2  ;;  %v2272_v33 = vld [vmem:[#allocation2 + $0xc8] ss:$12 sps:$4 sm:$0xff]  }
 0x3ca   :  { %2048 = vmatprep.subr.bf16.mxu1 %v2493_v2 }
 0x3cb   :  { %v2332_v34 = vpop.eup %2331 }
 0x3cc   :  { %v493_v35 = vmul.f32 %v2332_v34, %v2328_v20  ;;  %v2287_v20 = vld [vmem:[#allocation2 + $0x124] ss:$12 sps:$4 sm:$0xff]  }
 0x3ce   :  { %v495_v36 = vpack.c.bf16 %v493_v35, %v493_v35  ;;  %v2276_v35 = vld [vmem:[#allocation2 + $0xe0] ss:$12 sps:$4 sm:$0xff]  }
 0x3d0   :  { %2025 = vmatmul.mubr.msk.bf16.vlgmr.msra.gmra.mrb[16].mxu1 %vm471_vm2, %v495_v36  ;;  %v2280_v36 = vld [vmem:[#allocation2 + $0xf8] ss:$12 sps:$4 sm:$0xff]  }
 0x3d1   :  { %2064 = vmatprep.mubr.msk.bf16.mxu1 %vm2494_vm0, %v2493_v2  ;;  %2049 = vmatpush3.bf16.msra.mxu1 %v2253_v40  ;;  %v2295_v40 = vld [vmem:[#allocation2 + $0x154] ss:$12 sps:$4 sm:$0xff]  }
 0x3d2   :  { %2050 = vmatprep.subr.bf16.mxu1 %v2493_v2 }
 0x3d5   :  { %2051 = vmatpush3.bf16.msra.mxu1 %v2254_v41  ;;  %v2293_v41 = vld [vmem:[#allocation2 + $0x150] ss:$12 sps:$4 sm:$0xff]  }
 0x3d6   :  { %2052 = vmatprep.subr.bf16.mxu1 %v2493_v2 }
 0x3d9   :  { %2053 = vmatpush3.bf16.msra.mxu1 %v2255_v42  ;;  %v2296_v42 = vld [vmem:[#allocation2 + $0x158] ss:$12 sps:$4 sm:$0xff]  }
 0x3da   :  { %2054 = vmatprep.subr.bf16.mxu1 %v2493_v2 }
 0x3dd   :  { %2055 = vmatpush3.bf16.msra.mxu1 %v2256_v43  ;;  %v2299_v43 = vld [vmem:[#allocation2 + $0x16c] ss:$12 sps:$4 sm:$0xff]  }
 0x3de   :  { %2056 = vmatprep.subr.bf16.mxu1 %v2493_v2 }
 0x3e1   :  { %2057 = vmatpush3.bf16.msra.mxu1 %v2257_v44  ;;  %v2297_v44 = vld [vmem:[#allocation2 + $0x168] ss:$12 sps:$4 sm:$0xff]  }
 0x3e2   :  { %2058 = vmatprep.subr.bf16.mxu1 %v2493_v2 }
 0x3e5   :  { %2059 = vmatpush3.bf16.msra.mxu1 %v2258_v45  ;;  %v2300_v45 = vld [vmem:[#allocation2 + $0x170] ss:$12 sps:$4 sm:$0xff]  }
 0x3e6   :  { %2060 = vmatprep.subr.bf16.mxu1 %v2493_v2 }
 0x3e9   :  { %2061 = vmatpush3.bf16.msra.mxu1 %v2259_v57 }
 0x3ea   :  { %2062 = vmatprep.subr.bf16.mxu1 %v2493_v2 }
 0x3ed   :  { %2063 = vmatpush3.bf16.msra.mxu1 %v2260_v58 }
 0x49b   :  { %v537_v46 = vpop.f32.mrb[12].mxu1 }
 0x49c   :  { %v2020_v49 = vpop.f32.mrb[13].mxu1 }
 0x49d   :  { %v540_v50 = vpop.f32.mrb[14].mxu1 }
 0x49e   :  { %v2021_v51 = vpop.f32.mrb[15].mxu1 }
 0x4a3   :  { %v583_v52 = vpop.f32.mrb[16].mxu1 }
 0x4a4   :  { %v589_v53 = vpack.c.bf16 %v583_v52, %v537_v46  ;;  %v2026_v54 = vpop.f32.mrb[17].mxu1  ;;  %v1831_v46 = vld [vmem:[%s2843_s9] ss:$0 sm:$0xff] }
 0x4a5   :  { %v586_v55 = vpop.f32.mrb[18].mxu1 }
 0x4a6   :  { %v2027_v56 = vpop.f32.mrb[19].mxu1  ;;  %2045 = vmatmul.mubr.bf16.vlgmr.msra.gmra.mrb[4].mxu0 %v589_v53 }
 0x4a7   :  { %2084 = vmatprep.mubr.msk.bf16.mxu0 %vm2494_vm0, %v2493_v2  ;;  %2069 = vmatpush3.bf16.msra.mxu0 %v2261_v59 }
 0x4a8   :  { %2070 = vmatprep.subr.bf16.mxu0 %v2493_v2 }
 0x4ab   :  { %2071 = vmatpush3.bf16.msra.mxu0 %v2262_v60 }
 0x4ac   :  { %2072 = vmatprep.subr.bf16.mxu0 %v2493_v2 }
 0x4af   :  { %2073 = vmatpush3.bf16.msra.mxu0 %v2263_v61 }
 0x4b0   :  { %2074 = vmatprep.subr.bf16.mxu0 %v2493_v2 }
 0x4b3   :  { %2075 = vmatpush3.bf16.msra.mxu0 %v2264_v62 }
 0x4b4   :  { %2076 = vmatprep.subr.bf16.mxu0 %v2493_v2 }
 0x4b7   :  { %2077 = vmatpush3.bf16.msra.mxu0 %v2265_v63 }
 0x4b8   :  { %2078 = vmatprep.subr.bf16.mxu0 %v2493_v2 }
 0x4bb   :  { %2079 = vmatpush3.bf16.msra.mxu0 %v2266_v0 }
 0x4bc   :  { %2080 = vmatprep.subr.bf16.mxu0 %v2493_v2 }
 0x4bf   :  { %2081 = vmatpush3.bf16.msra.mxu0 %v2267_v13 }
 0x4c0   :  { %2082 = vmatprep.subr.bf16.mxu0 %v2493_v2 }
 0x4c3   :  { %2083 = vmatpush3.bf16.msra.mxu0 %v2268_v14 }
 0x4c4   :  { %2088 = vmatprep.subr.bf16.mxu0 %v2493_v2 }
 0x579   :  { %v695_v4 = vpop.f32.mrb[4].mxu0 }
 0x57a   :  { %v696_v5 = vadd.f32 %v1813_v3, %v695_v4  ;;  %v2046_v6 = vpop.f32.mrb[5].mxu0 }
 0x57b   :  { %v698_v7 = vpop.f32.mrb[6].mxu0 }
 0x57c   :  { %v699_v8 = vadd.f32 %v1813_v3, %v698_v7  ;;  %v2047_v9 = vpop.f32.mrb[7].mxu0  ;;  %v2712_v10 = vadd.f32 %v696_v5, %v2651_v47  ;;  %v2271_v47 = vld [vmem:[#allocation2 + $0xc4] ss:$12 sps:$4 sm:$0xff]  }
 0x57d   :  { %1096 = vmatprep.subr.bf16.mxu1 %v2271_v47 }
 0x57e   :  { %v2715_v11 = vadd.f32 %v699_v8, %v2653_v48  ;;  %v2273_v48 = vld [vmem:[#allocation2 + $0xd8] ss:$12 sps:$4 sm:$0xff]  }
 0x580   :  { %v704_v12 = vpack.c.bf16 %v2715_v11, %v2712_v10 }
 0x582   :  { %2065 = vmatmul.mubr.bf16.vlgmr.msra.gmra.mrb[20].mxu1 %v704_v12 }
 0x583   :  { %1128 = vmatprep.mubr.bf16.mxu1 %v2492_v1  ;;  %1097 = vmatpush1.bf16.msra.mxu1 %v2269_v15  ;;  %v2283_v1 = vld [vmem:[#allocation2 + $0x10c] ss:$12 sps:$4 sm:$0xff]  }
 0x584   :  { %1098 = vmatprep.subr.bf16.mxu1 %v2275_v16 }
 0x587   :  { %1099 = vmatpush1.bf16.msra.mxu1 %v2273_v48 }
 0x588   :  { %1100 = vmatprep.subr.bf16.mxu1 %v2279_v17 }
 0x58b   :  { %1101 = vmatpush1.bf16.msra.mxu1 %v2277_v18 }
 0x58c   :  { %1102 = vmatprep.subr.bf16.mxu1 %v2283_v1 }
 0x58f   :  { %1103 = vmatpush1.bf16.msra.mxu1 %v2281_v19 }
 0x590   :  { %1104 = vmatprep.subr.bf16.mxu1 %v2287_v20 }
 0x593   :  { %1105 = vmatpush1.bf16.msra.mxu1 %v2285_v21 }
 0x594   :  { %1106 = vmatprep.subr.bf16.mxu1 %v2291_v22 }
 0x597   :  { %1107 = vmatpush1.bf16.msra.mxu1 %v2289_v23 }
 0x598   :  { %1108 = vmatprep.subr.bf16.mxu1 %v2295_v40 }
 0x59b   :  { %1109 = vmatpush1.bf16.msra.mxu1 %v2293_v41 }
 0x59c   :  { %1110 = vmatprep.subr.bf16.mxu1 %v2299_v43  ;;  %v2307_v43 = vld [vmem:[#allocation5 + $0x70] sm:$0xff]  }
 0x59f   :  { %1111 = vmatpush1.bf16.msra.mxu1 %v2297_v44  ;;  %v2308_v44 = vld [vmem:[#allocation5 + $0x78] sm:$0xff]  }
 0x5a0   :  { %2108 = vmatprep.subr.bf16.mxu1 %v2493_v2 }
 0x655   :  { %v810_v25 = vpop.f32.mrb[20].mxu1 }
 0x656   :  { %v811_v26 = vadd.f32 %v1822_v24, %v810_v25  ;;  %v2066_v27 = vpop.f32.mrb[21].mxu1 }
 0x657   :  { %v813_v28 = vpop.f32.mrb[22].mxu1  ;;  %v2301_v27 = vld [vmem:[#allocation5 + $0x40] sm:$0xff]  }
 0x658   :  { %v814_v29 = vadd.f32 %v1822_v24, %v813_v28  ;;  %v2067_v30 = vpop.f32.mrb[23].mxu1  ;;  %v817_v31 = vmax.f32 %v811_v26, 0.0  ;;  %v2302_v28 = vld [vmem:[#allocation5 + $0x48] sm:$0xff]  }
 0x659   :  { %v2304_v30 = vld [vmem:[#allocation5 + $0x58] sm:$0xff]  }
 0x65a   :  { %v818_v32 = vmax.f32 %v814_v29, 0.0  ;;  %v2303_v29 = vld [vmem:[#allocation5 + $0x50] sm:$0xff]  }
 0x65c   :  { %v819_v34 = vpack.c.bf16 %v818_v32, %v817_v31  ;;  %v2305_v31 = vld [vmem:[#allocation5 + $0x60] sm:$0xff]  }
 0x65e   :  { %2085 = vmatmul.mubr.bf16.vlgmr.msra.gmra.mrb[8].mxu0 %v819_v34 }
 0x65f   :  { %2089 = vmatpush3.bf16.msra.mxu0 %v2272_v33  ;;  %2104 = vmatprep.mubr.msk.bf16.mxu0 %vm2494_vm0, %v2493_v2 }
 0x660   :  { %2090 = vmatprep.subr.bf16.mxu0 %v2493_v2 }
 0x663   :  { %2091 = vmatpush3.bf16.msra.mxu0 %v2276_v35 }
 0x664   :  { %2092 = vmatprep.subr.bf16.mxu0 %v2493_v2 }
 0x667   :  { %2093 = vmatpush3.bf16.msra.mxu0 %v2280_v36 }
 0x668   :  { %2094 = vmatprep.subr.bf16.mxu0 %v2493_v2 }
 0x66b   :  { %2095 = vmatpush3.bf16.msra.mxu0 %v2284_v37 }
 0x66c   :  { %2096 = vmatprep.subr.bf16.mxu0 %v2493_v2 }
 0x66f   :  { %2097 = vmatpush3.bf16.msra.mxu0 %v2288_v38 }
 0x670   :  { %2098 = vmatprep.subr.bf16.mxu0 %v2493_v2 }
 0x673   :  { %2099 = vmatpush3.bf16.msra.mxu0 %v2292_v39 }
 0x674   :  { %2100 = vmatprep.subr.bf16.mxu0 %v2493_v2 }
 0x677   :  { %2101 = vmatpush3.bf16.msra.mxu0 %v2296_v42  ;;  %v2306_v42 = vld [vmem:[#allocation5 + $0x68] sm:$0xff]  }
 0x678   :  { %2102 = vmatprep.subr.bf16.mxu0 %v2493_v2 }
 0x67b   :  { %2103 = vmatpush3.bf16.msra.mxu0 %v2300_v45  ;;  %v2309_v45 = vld [vmem:[#allocation7 + $0x40] sm:$0xff]  }
 0x67c   :  { %2132 = vmatprep.subr.bf16.mxu0 %v2493_v2 }
 0x731   :  { %v925_v49 = vpop.f32.mrb[8].mxu0 }
 0x732   :  { %v926_v50 = vadd.f32 %v1831_v46, %v925_v49  ;;  %v2086_v51 = vpop.f32.mrb[9].mxu0  ;;  %v2311_v49 = vld [vmem:[#allocation7 + $0x50] sm:$0xff]  }
 0x733   :  { %v928_v52 = vpop.f32.mrb[10].mxu0  ;;  %v2313_v51 = vld [vmem:[#allocation7 + $0x60] sm:$0xff]  }
 0x734   :  { %v929_v53 = vadd.f32 %v1831_v46, %v928_v52  ;;  %v2087_v54 = vpop.f32.mrb[11].mxu0  ;;  %v2740_v55 = vadd.f32 %v926_v50, %v2712_v10  ;;  %v2310_v46 = vld [vmem:[#allocation7 + $0x48] sm:$0xff]   ;;  %v2312_v50 = vld [vmem:[#allocation7 + $0x58] sm:$0xff]  }
 0x735   :  { %v2314_v52 = vld [vmem:[#allocation7 + $0x68] sm:$0xff]  }
 0x736   :  { %v2743_v56 = vadd.f32 %v929_v53, %v2715_v11 }
 0x738   :  { %v934_v57 = vpack.c.bf16 %v2743_v56, %v2740_v55 }
 0x73a   :  { %1129 = vmatmul.mubr.bf16.vlgmr.msra.gmra.mrb[24].mxu1 %v934_v57  ;;  %2105 = vmatmul.mubr.bf16.vlgmr.msra.gmra.mrb[12].mxu0 %v934_v57 }
 0x73b   :  { %2110 = vmatprep.mubr.msk.bf16.mxu1 %vm2494_vm0, %v2493_v2  ;;  %2148 = vmatprep.mubr.msk.bf16.mxu0 %vm2494_vm0, %v2493_v2 }
 0x73c   :  { %2133 = vmatpush3.bf16.msra.mxu0 %v2301_v27 }
 0x73d   :  { %2134 = vmatprep.subr.bf16.mxu0 %v2493_v2 }
 0x740   :  { %2135 = vmatpush3.bf16.msra.mxu0 %v2302_v28 }
 0x741   :  { %2136 = vmatprep.subr.bf16.mxu0 %v2493_v2 }
 0x744   :  { %2137 = vmatpush3.bf16.msra.mxu0 %v2303_v29 }
 0x745   :  { %2138 = vmatprep.subr.bf16.mxu0 %v2493_v2 }
 0x748   :  { %2139 = vmatpush3.bf16.msra.mxu0 %v2304_v30 }
 0x749   :  { %2140 = vmatprep.subr.bf16.mxu0 %v2493_v2 }
 0x74c   :  { %2141 = vmatpush3.bf16.msra.mxu0 %v2305_v31 }
 0x74d   :  { %2142 = vmatprep.subr.bf16.mxu0 %v2493_v2 }
 0x750   :  { %2143 = vmatpush3.bf16.msra.mxu0 %v2306_v42 }
 0x751   :  { %2144 = vmatprep.subr.bf16.mxu0 %v2493_v2 }
 0x754   :  { %2145 = vmatpush3.bf16.msra.mxu0 %v2307_v43 }
 0x755   :  { %2146 = vmatprep.subr.bf16.mxu0 %v2493_v2 }
 0x758   :  { %2147 = vmatpush3.bf16.msra.mxu0 %v2308_v44 }
 0x759   :  { %2172 = vmatprep.subr.bf16.mxu0 %v2493_v2 }
 0x80d   :  { %v1130_v58 = vpop.f32.mrb[24].mxu1  ;;  %v1173_v59 = vpop.f32.mrb[12].mxu0 }
 0x80e   :  { %v1132_v60 = vpop.f32.mrb[25].mxu1  ;;  %v2106_v61 = vpop.f32.mrb[13].mxu0  ;;  %v1180_v5 = vpack.c.bf16 %v1130_v58, %v1130_v58  ;;  %v1184_v7 = vpack.c.bf16 %v1173_v59, %v1173_v59 }
 0x80f   :  { %v1182_v62 = vpack.c.bf16 %v1132_v60, %v1132_v60  ;;  %v1134_v63 = vpop.f32.mrb[26].mxu1  ;;  %v2751_v0 = vpop.f32.mrb[14].mxu0 }
 0x810   :  { %v1136_v3 = vpop.f32.mrb[27].mxu1  ;;  %v2107_v4 = vpop.f32.mrb[15].mxu0  ;;  %v1181_v8 = vpack.c.bf16 %v1134_v63, %v1134_v63  ;;  %v1294_v9 = vsel %vm499_vm1, %v1184_v7, 0  ;;  %v1185_v35 = vpack.c.bf16 %v2751_v0, %v2751_v0  ;;  %v2315_v0 = vld [vmem:[#allocation7 + $0x70] sm:$0xff]   ;;  %v2320_v7 = vld [vmem:[#allocation8 + $0x58] sm:$0xff]  }
 0x811   :  { %2109 = vmatpush3.bf16.xpose.msra.mxu1 %v1182_v62  ;;  %v1183_v6 = vpack.c.bf16 %v1136_v3, %v1136_v3  ;;  %v2316_v3 = vld [vmem:[#allocation7 + $0x78] sm:$0xff]   ;;  %v2317_v4 = vld [vmem:[#allocation8 + $0x40] sm:$0xff]  }
 0x812   :  { %2114 = vmatprep.subr.bf16.mxu1 %v2493_v2  ;;  %v1340_v38 = vsel %vm499_vm1, %v1185_v35, 0 }
 0x818   :  { %2111 = vmatmul.mubr.bf16.vlgmr.msra.gmra.mrb[28].mxu1 %v1180_v5  ;;  %v2318_v5 = vld [vmem:[#allocation8 + $0x48] sm:$0xff]  }
 0x819   :  { %2115 = vmatpush3.bf16.xpose.msra.mxu1 %v1183_v6  ;;  %2116 = vmatprep.mubr.msk.bf16.mxu1 %vm2494_vm0, %v2493_v2  ;;  %v2319_v6 = vld [vmem:[#allocation8 + $0x50] sm:$0xff]  }
 0x81a   :  { %2120 = vmatprep.subr.bf16.mxu1 %v2493_v2 }
 0x820   :  { %2117 = vmatmul.mubr.bf16.vlgmr.msra.gmra.mrb[32].mxu1 %v1181_v8  ;;  %v2321_v8 = vld [vmem:[#allocation8 + $0x60] sm:$0xff]  }
 0x821   :  { %2121 = vmatpush3.bf16.msra.mxu1 %v1294_v9  ;;  %2122 = vmatprep.mubr.msk.bf16.mxu1 %vm2494_vm0, %v2493_v2  ;;  %v2322_v9 = vld [vmem:[#allocation8 + $0x68] sm:$0xff]  }
 0x822   :  { %2126 = vmatprep.subr.bf16.mxu1 %v2493_v2 }
 0x8eb   :  { %v1220_v10 = vpop.f32.mrb[28].mxu1 }
 0x8ec   :  { %v2112_v11 = vpop.f32.mrb[29].mxu1  ;;  %v1266_v12 = vsel %vm471_vm2, %v1220_v10, -inf }
 0x8ed   :  { %1267 = vmax.xlane.f32.xlu1 %v1266_v12  ;;  %v1223_v13 = vpop.f32.mrb[30].mxu1 }
 0x8ee   :  { %v2113_v14 = vpop.f32.mrb[31].mxu1 }
 0x8f3   :  { %v1260_v15 = vpop.f32.mrb[32].mxu1 }
 0x8f4   :  { %v2118_v47 = vpop.f32.mrb[33].mxu1  ;;  %v1269_v16 = vsel %vm471_vm2, %v1260_v15, -inf }
 0x8f5   :  { %1270 = vmax.xlane.f32.xlu0 %v1269_v16  ;;  %v1263_v48 = vpop.f32.mrb[34].mxu1 }
 0x8f6   :  { %v2119_v17 = vpop.f32.mrb[35].mxu1 }
 0x97a   :  { %v1268_v18 = vpop.xlane.xlu1 %1267 }
 0x97b   :  { %v1272_v1 = vsub.f32 %v1220_v10, %v1268_v18  ;;  %v1867_v10 = vld [vmem:[%s2839_s5 + $0x1] ss:$0 sm:$0xff] }
 0x97c   :  { %v2323_v18 = vld [vmem:[#allocation8 + $0x70] sm:$0xff]  }
 0x97d   :  { %v1274_v19 = vmul.f32 1.442695, %v1272_v1  ;;  %v2324_v1 = vld [vmem:[#allocation8 + $0x78] sm:$0xff]  }
 0x97f   :  { %2333 = vpow2.f32 %v1274_v19  ;;  %v1877_v19 = vld [vmem:[%s2841_s7 + $0x1] ss:$0 sm:$0xff]  ;;  %s1756_s7 = sshll.u32 %s2495_s23, 4  ;;  %s1757_s7 = int_to_ptr.vmem [resolvable:$true] %s1756_s7 }
 0x980   :  { %s2429_s24 = scalar_lea.vmem %s1757_s7, 256  ;;  %p2434_p5 = scmp.lt.s32.totalorder %s1757_s7, %s1757_s7 }
 0x981   :  { %p2430_p4 = scmp.ne.s32.totalorder %s1757_s7, %s2429_s24  ;;  %p2435_p6 = scmp.lt.s32.totalorder %s2429_s24, %s2429_s24 }
 0x982   :  { %v1271_v20 = vpop.xlane.xlu0 %1270 }
 0x983   :  { %v1273_v21 = vsub.f32 %v1260_v15, %v1271_v20  ;;  %p2436_p7 = por %p2435_p6, %p2434_p5 }
 0x985   :  { %v1276_v22 = vmul.f32 1.442695, %v1273_v21  ;;  %p2437_p8 = pnand %p2436_p7, %p2430_p4 }
 0x987   :  { %2335 = vpow2.f32 %v1276_v22 }
 0x989   :  { %v2334_v23 = vpop.eup %2333 }
 0x98a   :  { %v1278_v24 = vsel %vm471_vm2, %v2334_v23, 0.0 }
 0x98b   :  { %1279 = vadd.xlane.f32.xlu1 %v1278_v24 }
 0x991   :  { %v2336_v25 = vpop.eup %2335 }
 0x992   :  { %v1281_v26 = vsel %vm471_vm2, %v2336_v25, 0.0 }
 0x993   :  { %1282 = vadd.xlane.f32.xlu0 %v1281_v26 }
 0xa18   :  { %v1280_v32 = vpop.xlane.xlu1 %1279 }
 0xa19   :  { %2337 = vrcp.f32 %v1280_v32 }
 0xa20   :  { %v1283_v33 = vpop.xlane.xlu0 %1282 }
 0xa21   :  { %2339 = vrcp.f32 %v1283_v33 }
 0xa23   :  { %v2338_v34 = vpop.eup %2337 }
 0xa24   :  { %v1286_v36 = vmul.f32 %v2338_v34, %v2334_v23 }
 0xa26   :  { %v1288_v37 = vpack.c.bf16 %v1286_v36, %v1286_v36 }
 0xa28   :  { %2123 = vmatmul.mubr.msk.bf16.vlgmr.msra.gmra.mrb[36].mxu1 %vm471_vm2, %v1288_v37 }
 0xa29   :  { %2127 = vmatpush3.bf16.msra.mxu1 %v1340_v38  ;;  %2128 = vmatprep.mubr.msk.bf16.mxu1 %vm2494_vm0, %v2493_v2 }
 0xa2a   :  { %2152 = vmatprep.subr.bf16.mxu1 %v2493_v2 }
 0xa2b   :  { %v2340_v39 = vpop.eup %2339 }
 0xa2c   :  { %v1287_v40 = vmul.f32 %v2340_v39, %v2336_v25 }
 0xa2e   :  { %v1289_v41 = vpack.c.bf16 %v1287_v40, %v1287_v40 }
 0xa30   :  { %2129 = vmatmul.mubr.msk.bf16.vlgmr.msra.gmra.mrb[40].mxu1 %vm471_vm2, %v1289_v41 }
 0xa31   :  { %2168 = vmatprep.mubr.msk.bf16.mxu1 %vm2494_vm0, %v2493_v2  ;;  %2153 = vmatpush3.bf16.msra.mxu1 %v2309_v45 }
 0xa32   :  { %2154 = vmatprep.subr.bf16.mxu1 %v2493_v2 }
 0xa35   :  { %2155 = vmatpush3.bf16.msra.mxu1 %v2310_v46 }
 0xa36   :  { %2156 = vmatprep.subr.bf16.mxu1 %v2493_v2 }
 0xa39   :  { %2157 = vmatpush3.bf16.msra.mxu1 %v2311_v49 }
 0xa3a   :  { %2158 = vmatprep.subr.bf16.mxu1 %v2493_v2 }
 0xa3d   :  { %2159 = vmatpush3.bf16.msra.mxu1 %v2312_v50 }
 0xa3e   :  { %2160 = vmatprep.subr.bf16.mxu1 %v2493_v2 }
 0xa41   :  { %2161 = vmatpush3.bf16.msra.mxu1 %v2313_v51 }
 0xa42   :  { %2162 = vmatprep.subr.bf16.mxu1 %v2493_v2 }
 0xa45   :  { %2163 = vmatpush3.bf16.msra.mxu1 %v2314_v52 }
 0xa46   :  { %2164 = vmatprep.subr.bf16.mxu1 %v2493_v2 }
 0xa49   :  { %2165 = vmatpush3.bf16.msra.mxu1 %v2315_v0 }
 0xa4a   :  { %2166 = vmatprep.subr.bf16.mxu1 %v2493_v2 }
 0xa4d   :  { %2167 = vmatpush3.bf16.msra.mxu1 %v2316_v3 }
 0xafb   :  { %v1330_v53 = vpop.f32.mrb[36].mxu1 }
 0xafc   :  { %v2124_v54 = vpop.f32.mrb[37].mxu1 }
 0xafd   :  { %v1333_v57 = vpop.f32.mrb[38].mxu1 }
 0xafe   :  { %v2125_v58 = vpop.f32.mrb[39].mxu1 }
 0xb03   :  { %v1376_v59 = vpop.f32.mrb[40].mxu1 }
 0xb04   :  { %v1382_v60 = vpack.c.bf16 %v1376_v59, %v1330_v53  ;;  %v2130_v61 = vpop.f32.mrb[41].mxu1 }
 0xb05   :  { %v1379_v62 = vpop.f32.mrb[42].mxu1 }
 0xb06   :  { %v2131_v63 = vpop.f32.mrb[43].mxu1  ;;  %2149 = vmatmul.mubr.bf16.vlgmr.msra.gmra.mrb[16].mxu0 %v1382_v60 }
 0xb07   :  { %2188 = vmatprep.mubr.msk.bf16.mxu0 %vm2494_vm0, %v2493_v2  ;;  %2173 = vmatpush3.bf16.msra.mxu0 %v2317_v4 }
 0xb08   :  { %2174 = vmatprep.subr.bf16.mxu0 %v2493_v2 }
 0xb0b   :  { %2175 = vmatpush3.bf16.msra.mxu0 %v2318_v5 }
 0xb0c   :  { %2176 = vmatprep.subr.bf16.mxu0 %v2493_v2 }
 0xb0f   :  { %2177 = vmatpush3.bf16.msra.mxu0 %v2319_v6 }
 0xb10   :  { %2178 = vmatprep.subr.bf16.mxu0 %v2493_v2 }
 0xb13   :  { %2179 = vmatpush3.bf16.msra.mxu0 %v2320_v7 }
 0xb14   :  { %2180 = vmatprep.subr.bf16.mxu0 %v2493_v2 }
 0xb17   :  { %2181 = vmatpush3.bf16.msra.mxu0 %v2321_v8 }
 0xb18   :  { %2182 = vmatprep.subr.bf16.mxu0 %v2493_v2 }
 0xb1b   :  { %2183 = vmatpush3.bf16.msra.mxu0 %v2322_v9 }
 0xb1c   :  { %2184 = vmatprep.subr.bf16.mxu0 %v2493_v2 }
 0xb1f   :  { %2185 = vmatpush3.bf16.msra.mxu0 %v2323_v18 }
 0xb20   :  { %2186 = vmatprep.subr.bf16.mxu0 %v2493_v2  ;;  %v1887_v2 = vld [vmem:[%s2843_s9 + $0x1] ss:$0 sm:$0xff] }
 0xb23   :  { %2187 = vmatpush3.bf16.msra.mxu0 %v2324_v1 }
 0xbd9   :  { %v1490_v11 = vpop.f32.mrb[16].mxu0 }
 0xbda   :  { %v1491_v12 = vadd.f32 %v1867_v10, %v1490_v11  ;;  %v2150_v13 = vpop.f32.mrb[17].mxu0 }
 0xbdb   :  { %v1493_v14 = vpop.f32.mrb[18].mxu0 }
 0xbdc   :  { %v1494_v15 = vadd.f32 %v1867_v10, %v1493_v14  ;;  %v2151_v47 = vpop.f32.mrb[19].mxu0  ;;  %v1497_v16 = vadd.f32 %v1491_v12, %v2740_v55 }
 0xbde   :  { %v1498_v48 = vadd.f32 %v1494_v15, %v2743_v56 }
 0xbe0   :  { %v1499_v17 = vpack.c.bf16 %v1498_v48, %v1497_v16 }
 0xbe2   :  { %2169 = vmatmul.mubr.bf16.vlgmr.msra.gmra.mrb[44].mxu1 %v1499_v17 }
 0xcb5   :  { %v1607_v20 = vpop.f32.mrb[44].mxu1 }
 0xcb6   :  { %v1608_v21 = vadd.f32 %v1877_v19, %v1607_v20  ;;  %v2170_v22 = vpop.f32.mrb[45].mxu1 }
 0xcb7   :  { %v1610_v23 = vpop.f32.mrb[46].mxu1 }
 0xcb8   :  { %v1611_v24 = vadd.f32 %v1877_v19, %v1610_v23  ;;  %v2171_v55 = vpop.f32.mrb[47].mxu1  ;;  %v1614_v25 = vmax.f32 %v1608_v21, 0.0 }
 0xcba   :  { %v1615_v56 = vmax.f32 %v1611_v24, 0.0 }
 0xcbc   :  { %v1616_v26 = vpack.c.bf16 %v1615_v56, %v1614_v25 }
 0xcbe   :  { %2189 = vmatmul.mubr.bf16.vlgmr.msra.gmra.mrb[20].mxu0 %v1616_v26 }
 0xd91   :  { %v1724_v27 = vpop.f32.mrb[20].mxu0 }
 0xd92   :  { %v1725_v28 = vadd.f32 %v1887_v2, %v1724_v27  ;;  %v2190_v29 = vpop.f32.mrb[21].mxu0 }
 0xd93   :  { %v1727_v30 = vpop.f32.mrb[22].mxu0 }
 0xd94   :  { %v1731_v31 = vadd.f32 %v1725_v28, %v1497_v16  ;;  %v1728_v32 = vadd.f32 %v1887_v2, %v1727_v30  ;;  %v2191_v33 = vpop.f32.mrb[23].mxu0 }
 0xd96   :  { %1733 = vst [vmem:[#allocation10] sm:$0xff] %v1731_v31  ;;  %v1735_v34 = vrot.slane %v1731_v31, 4  ;;  %v1732_v35 = vadd.f32 %v1728_v32, %v1498_v48 }
 0xd98   :  { %v1736_v36 = vadd.f32 %v1735_v34, %v1731_v31  ;;  %1734 = vst [vmem:[#allocation10 + $0x8] sm:$0xff] %v1732_v35  ;;  %v1741_v37 = vrot.slane %v1732_v35, 4 }
 0xd99   :  { %2440 = shalt.err (!%p2437_p8)
}
 0xd9a   :  { %s2441_s29 = scalar_lea.hbm %s2844_s10, 256 }
 0xd9b   :  { %p2442_p9 = scmp.ne.s32.totalorder %s2844_s10, %s2441_s29  ;;  %p2445_p10 = scmp.lt.u32.totalorder %s2441_s29, %s2844_s10 }
 0xd9d   :  { %p2447_p11 = pnand %p2445_p10, %p2442_p9 }
 0xd9f   :  { %2450 = shalt.err (!%p2447_p11)
}
 0xda0   :  { %s2496_s15 = smov 128   ;;  %s2497_s8 = smov 8   ;;  %v1737_v38 = vrot.slane %v1736_v36, 2  ;;  %v1742_v39 = vadd.f32 %v1741_v37, %v1732_v35 }
 0xda1   :  { %1762 = dma.vmem_to_hbm [thread:$0]  %s1757_s7, 256, %s2844_s10, [#allocation4], %s2496_s15, %s2496_s15, %s2497_s8  }
 0xda2   :  { %v1738_v40 = vadd.f32 %v1737_v38, %v1736_v36  ;;  %v1743_v41 = vrot.slane %v1742_v39, 2  ;;  %s2498_s28 = smov [#allocation11]  }
 0xda3   :  { %s1768_s30 = sshll.u32 %s2498_s28, 4  ;;  %s1769_s30 = int_to_ptr.vmem [resolvable:$true] %s1768_s30 }
 0xda4   :  { %v1739_v42 = vrot.slane %v1738_v40, 1  ;;  %v1744_v43 = vadd.f32 %v1743_v41, %v1742_v39  ;;  %s2451_s16 = scalar_lea.vmem %s1769_s30, 32  ;;  %p2456_p13 = scmp.lt.s32.totalorder %s1769_s30, %s1769_s30 }
 0xda5   :  { %p2452_p12 = scmp.ne.s32.totalorder %s1769_s30, %s2451_s16  ;;  %p2457_p0 = scmp.lt.s32.totalorder %s2451_s16, %s2451_s16 }
 0xda6   :  { %v1745_v44 = vrot.slane %v1744_v43, 1  ;;  %v1740_v45 = vadd.f32 %v1739_v42, %v1738_v40 }
 0xda7   :  { %p2458_p1 = por %p2457_p0, %p2456_p13 }
 0xda8   :  { %v1746_v46 = vadd.f32 %v1745_v44, %v1744_v43  ;;  %v1747_v49 = vmul.f32 0.125, %v1740_v45 }
 0xda9   :  { %p2459_p2 = pnand %p2458_p1, %p2452_p12 }
 0xdaa   :  { %v1748_v50 = vmul.f32 0.125, %v1746_v46  ;;  %1749 = vst [vmem:[#allocation11] sm:$0x1] %v1747_v49 }
 0xdac   :  { %1750 = vst [vmem:[#allocation11 + $0x1] sm:$0x1] %v1748_v50 }
 0xdad   :  { %2462 = shalt.err (!%p2459_p2)
}
 0xdae   :  { %s2463_s2 = scalar_lea.hbm %s2845_s11, 32 }
 0xdaf   :  { %p2464_p3 = scmp.ne.s32.totalorder %s2845_s11, %s2463_s2  ;;  %p2467_p4 = scmp.lt.u32.totalorder %s2463_s2, %s2845_s11 }
 0xdb1   :  { %p2469_p5 = pnand %p2467_p4, %p2464_p3 }
 0xdb3   :  { %2472 = shalt.err (!%p2469_p5)
}
 0xdb4   :  { %s2499_s13 = smov 16   ;;  %s2500_s21 = smov 1  }
 0xdb5   :  { %1774 = dma.vmem_to_hbm [thread:$0]  %s1769_s30, 32, %s2845_s11, [#allocation12], %s2499_s13, %s2499_s13, %s2500_s21  }
 0xdb6   :  { %2479 = dma.done.wait [#allocation4], 256  }
 0xdb7   :  { %2480 = vsyncadd [#allocation4], 4294967040 }
 0xdb8   :  { %2481 = dma.done.wait [#allocation12], 32  }
 0xdb9   :  { %2482 = vsyncadd [#allocation12], 4294967264 }
 0xdba   :  { %1781 = vsyncpa [#allocation3], 1 }
 0xdbb   :  { %1782 = vsyncpa [#allocation6], 1 }
 0xdbc   :  { %1783 = vsyncpa [#allocation9], 1 }
 0xdbd   :  { %1784 = vsyncpa [#allocation4], 1 }
 0xdbe   :  { %1785 = vsyncpa [#allocation12], 1 }

</bundles_post_ra>
